<compile_context>
chip_gen: v7x
topology: tpu7x:2x2x1
jax: 0.10.0
libtpu: 0.0.40
codegen_flags: <defaults>
</compile_context>

<pallas_src>
import functools

import jax
import jax.numpy as jnp
from jax import lax
from jax.experimental import pallas as pl
from jax.experimental.pallas import tpu as pltpu

SCALES = (1, 3, 5, 7)      # MultiScaleDWConv kernel sizes
KMAX = 7                   # largest depthwise kernel
PAD = KMAX // 2            # unified 'same' padding

_INV_SQRT2 = 0.7071067811865476


def _gelu(x):
    # exact (erf) GELU, matching torch.nn.GELU default
    return 0.5 * x * (1.0 + lax.erf(x * _INV_SQRT2))


def _round_up(x, m):
    return (x + m - 1) // m * m


def _group_channels(dim, scales=SCALES):
    n = len(scales)
    return [dim - dim // n * (n - 1)] + [dim // n] * (n - 1)


# ---------------------------------------------------------------------------
# Kernel 1 / 3: pointwise (1x1) conv as bf16 MXU matmul, optional GELU,
# fused BN affine epilogue (f32).
# ---------------------------------------------------------------------------
def _pw_kernel(x_ref, w_ref, scale_ref, shift_ref, o_ref, *, apply_gelu):
    h = jnp.dot(x_ref[...], w_ref[...], preferred_element_type=jnp.float32)
    if apply_gelu:
        h = _gelu(h)
    o_ref[...] = (h * scale_ref[...] + shift_ref[...]).astype(o_ref.dtype)


def pointwise_conv_bn(x2d, w, bn_scale, bn_shift, *, apply_gelu, out_dtype,
                      tm=512):
    """x2d: [M, Cin]  w: [Cin, Cout]  -> [M, Cout] = affine(act(x2d @ w))."""
    M, Cin = x2d.shape
    Cout = w.shape[1]
    tm = min(tm, _round_up(M, 8))               # big M tiles; cdiv masks remainder
    tn = 256 if Cout % 256 == 0 else Cout       # MXU-friendly N tile when possible
    grid = (pl.cdiv(M, tm), Cout // tn)
    kernel = functools.partial(_pw_kernel, apply_gelu=apply_gelu)
    out_bytes = jnp.dtype(out_dtype).itemsize
    cost = pl.CostEstimate(
        flops=2 * M * Cin * Cout,
        transcendentals=M * Cout if apply_gelu else 0,
        bytes_accessed=M * Cin * 2 + Cin * Cout * 2 + M * Cout * out_bytes
        + 8 * Cout)
    return pl.pallas_call(
        kernel,
        out_shape=jax.ShapeDtypeStruct((M, Cout), out_dtype),
        grid=grid,
        in_specs=[
            pl.BlockSpec((tm, Cin), lambda i, j: (i, 0)),
            pl.BlockSpec((Cin, tn), lambda i, j: (0, j)),
            pl.BlockSpec((1, tn), lambda i, j: (0, j)),
            pl.BlockSpec((1, tn), lambda i, j: (0, j)),
        ],
        out_specs=pl.BlockSpec((tm, tn), lambda i, j: (i, j)),
        compiler_params=pltpu.CompilerParams(
            dimension_semantics=("parallel", "parallel")),
        cost_estimate=cost,
    )(x2d.astype(jnp.bfloat16), w.astype(jnp.bfloat16),
      bn_scale.reshape(1, Cout).astype(jnp.float32),
      bn_shift.reshape(1, Cout).astype(jnp.float32))


# ---------------------------------------------------------------------------
# Kernel 2: multi-scale depthwise conv + bias + residual + GELU + BN affine.
# Halo is built in a VMEM scratch; channel groups with lane-aligned (128)
# boundaries only run their own k*k taps.
# ---------------------------------------------------------------------------
def _dw_kernel(x_ref, w_ref, b_ref, scale_ref, shift_ref, o_ref, xpad_ref,
               *, segments):
    H, W, C = o_ref.shape[1], o_ref.shape[2], o_ref.shape[3]

    # Zero-padded image lives only in VMEM (no HBM pad pass).
    xpad_ref[...] = jnp.zeros_like(xpad_ref)
    xpad_ref[PAD:PAD + H, PAD:PAD + W, :] = x_ref[0].astype(jnp.float32)

    # Row blocking keeps the f32 accumulator in a bounded number of vregs.
    max_gc = max(gc for _, gc, _ in segments)
    row_blk = max(1, min(H, (16 * 1024) // (W * max_gc)))

    for c0, gc, ksz in segments:               # static python loop
        sl = slice(c0, c0 + gc)
        p0 = (KMAX - ksz) // 2                 # centered sub-kernel offset
        b_s = b_ref[0, sl]
        scale_s = scale_ref[0, sl]
        shift_s = shift_ref[0, sl]
        for r0 in range(0, H, row_blk):
            tr = min(row_blk, H - r0)
            acc = jnp.zeros((tr, W, gc), jnp.float32)
            for dy in range(ksz):
                wrow = w_ref[p0 + dy, p0:p0 + ksz, sl]          # (ksz, gc)
                for dx in range(ksz):
                    acc = acc + (
                        xpad_ref[r0 + p0 + dy:r0 + p0 + dy + tr,
                                 p0 + dx:p0 + dx + W, sl] * wrow[dx])
            resid = xpad_ref[r0 + PAD:r0 + PAD + tr, PAD:PAD + W, sl]
            y = _gelu(acc + b_s + resid)
            o_ref[0, r0:r0 + tr, :, sl] = (
                y * scale_s + shift_s).astype(o_ref.dtype)


def dwconv_residual_bn(h_nhwc, dw_w, dw_b, bn_scale, bn_shift):
    B, H, W, C = h_nhwc.shape
    groups = _group_channels(C)
    segs, off = [], 0
    for ksz, gc in zip(SCALES, groups):
        segs.append((off, gc, ksz))
        off += gc
    # Exploit the multi-scale sparsity only when group boundaries are 128-lane
    # aligned; otherwise fall back to the identical unified zero-padded 7x7.
    if not all(o % 128 == 0 and g % 128 == 0 for o, g, _ in segs):
        segs = [(0, C, KMAX)]
    kernel = functools.partial(_dw_kernel, segments=tuple(segs))
    taps = sum(g * k * k for _, g, k in segs)
    cost = pl.CostEstimate(
        flops=2 * B * H * W * taps + 6 * B * H * W * C,
        transcendentals=B * H * W * C,
        bytes_accessed=4 * B * H * W * C + 4 * KMAX * KMAX * C + 12 * C)
    # TODO(synk): for production H*W*C (e.g. 56x56x1536) add row tiling with a
    # halo so a single image block does not have to fit v7x's 64 MiB VMEM.
    return pl.pallas_call(
        kernel,
        out_shape=jax.ShapeDtypeStruct((B, H, W, C), jnp.bfloat16),
        grid=(B,),
        in_specs=[
            pl.BlockSpec((1, H, W, C), lambda b: (b, 0, 0, 0)),
            pl.BlockSpec((KMAX, KMAX, C), lambda b: (0, 0, 0)),
            pl.BlockSpec((1, C), lambda b: (0, 0)),
            pl.BlockSpec((1, C), lambda b: (0, 0)),
            pl.BlockSpec((1, C), lambda b: (0, 0)),
        ],
        out_specs=pl.BlockSpec((1, H, W, C), lambda b: (b, 0, 0, 0)),
        scratch_shapes=[
            pltpu.VMEM((H + 2 * PAD, W + 2 * PAD, C), jnp.float32)],
        compiler_params=pltpu.CompilerParams(
            dimension_semantics=("parallel",)),
        cost_estimate=cost,
    )(h_nhwc.astype(jnp.bfloat16), dw_w.astype(jnp.float32),
      dw_b.reshape(1, C).astype(jnp.float32),
      bn_scale.reshape(1, C).astype(jnp.float32),
      bn_shift.reshape(1, C).astype(jnp.float32))


# ---------------------------------------------------------------------------
# Full forward (glue in plain JAX; hot paths in Pallas, bf16 intermediates)
# ---------------------------------------------------------------------------
def mlp_forward(x_nchw, params):
    B, Cin, H, W = x_nchw.shape
    Ch = params["w1"].shape[1]
    Cout = params["w2"].shape[1]
    x = jnp.transpose(x_nchw.astype(jnp.bfloat16), (0, 2, 3, 1))   # -> NHWC

    # fc1: 1x1 conv (no bias) -> GELU -> BN     (bf16 out feeds the dw conv)
    h = pointwise_conv_bn(x.reshape(B * H * W, Cin), params["w1"],
                          params["bn1_scale"], params["bn1_shift"],
                          apply_gelu=True, out_dtype=jnp.bfloat16)
    h = h.reshape(B, H, W, Ch)

    # dwconv(x) + x -> GELU -> BN   (dropout p=0 is identity)
    h = dwconv_residual_bn(h, params["dw_w"], params["dw_b"],
                           params["bn2_scale"], params["bn2_shift"])

    # fc2: 1x1 conv (no bias) -> BN  (dropout p=0 is identity)
    y = pointwise_conv_bn(h.reshape(B * H * W, Ch), params["w2"],
                          params["bn3_scale"], params["bn3_shift"],
                          apply_gelu=False, out_dtype=jnp.float32)
    return jnp.transpose(y.reshape(B, H, W, Cout), (0, 3, 1, 2))   # -> NCHW


# ---------------------------------------------------------------------------
# Deterministic synthetic parameters (shapes from Mlp.__init__)
# ---------------------------------------------------------------------------
def make_params(key, in_features, hidden_features, eps=1e-5):
    ks = jax.random.split(key, 16)
    group_channels = _group_channels(hidden_features)

    def bn_affine(k, c):
        k1, k2, k3, k4 = jax.random.split(k, 4)
        gamma = 1.0 + 0.1 * jax.random.normal(k1, (c,), jnp.float32)
        beta = 0.1 * jax.random.normal(k2, (c,), jnp.float32)
        mean = 0.1 * jax.random.normal(k3, (c,), jnp.float32)
        var = jax.random.uniform(k4, (c,), jnp.float32, minval=0.5, maxval=1.5)
        scale = gamma / jnp.sqrt(var + eps)
        shift = beta - mean * scale
        return scale, shift

    w1 = 0.1 * jax.random.normal(ks[0], (in_features, hidden_features), jnp.float32)
    w2 = 0.1 * jax.random.normal(ks[1], (hidden_features, in_features), jnp.float32)
    bn1_scale, bn1_shift = bn_affine(ks[2], hidden_features)
    bn2_scale, bn2_shift = bn_affine(ks[3], hidden_features)
    bn3_scale, bn3_shift = bn_affine(ks[4], in_features)

    # multi-scale depthwise weights, zero-padded into a unified 7x7 kernel
    dw_w = jnp.zeros((KMAX, KMAX, hidden_features), jnp.float32)
    off = 0
    for i, (ksz, gc) in enumerate(zip(SCALES, group_channels)):
        wk = 0.1 * jax.random.normal(ks[5 + i], (ksz, ksz, gc), jnp.float32)
        p = (KMAX - ksz) // 2
        dw_w = dw_w.at[p:p + ksz, p:p + ksz, off:off + gc].set(wk)
        off += gc
    dw_b = 0.1 * jax.random.normal(ks[10], (hidden_features,), jnp.float32)

    return dict(w1=w1, w2=w2, dw_w=dw_w, dw_b=dw_b,
                bn1_scale=bn1_scale, bn1_shift=bn1_shift,
                bn2_scale=bn2_scale, bn2_shift=bn2_shift,
                bn3_scale=bn3_scale, bn3_shift=bn3_shift)


# ---------------------------------------------------------------------------
# Pure-JAX f32 reference (numerical sanity check)
# ---------------------------------------------------------------------------
def mlp_reference(x_nchw, params):
    x = jnp.transpose(x_nchw, (0, 2, 3, 1)).astype(jnp.float32)
    C = params["w1"].shape[1]
    h = jnp.einsum("bhwc,cd->bhwd", x, params["w1"])
    h = _gelu(h) * params["bn1_scale"] + params["bn1_shift"]
    dw = lax.conv_general_dilated(
        h, params["dw_w"].reshape(KMAX, KMAX, 1, C),
        window_strides=(1, 1), padding="SAME",
        dimension_numbers=("NHWC", "HWIO", "NHWC"), feature_group_count=C)
    h2 = dw + params["dw_b"] + h
    h2 = _gelu(h2) * params["bn2_scale"] + params["bn2_shift"]
    y = jnp.einsum("bhwd,de->bhwe", h2, params["w2"])
    y = y * params["bn3_scale"] + params["bn3_shift"]
    return jnp.transpose(y, (0, 3, 1, 2))


if __name__ == "__main__":
    def run_case(B, Cin, H, W, hidden, key):
        kx, kp = jax.random.split(key)
        x = jax.random.normal(kx, (B, Cin, H, W), jnp.float32)   # NCHW
        params = make_params(kp, Cin, hidden)
        out = jax.block_until_ready(mlp_forward(x, params))
        assert out.shape == (B, Cin, H, W)
        ref = mlp_reference(x, params)
        rel_err = jnp.max(jnp.abs(out - ref)) / (jnp.max(jnp.abs(ref)) + 1e-6)
        assert float(rel_err) < 3e-2, f"relative error too large: {float(rel_err)}"

    key = jax.random.PRNGKey(0)
    k1, k2 = jax.random.split(key)
    # lane-aligned multi-scale groups (128 each), 256-wide N tiles, partial M tile
    run_case(2, 64, 16, 20, 512, k1)
    # small-channel fallback path (unified 7x7, full-dim channel blocks)
    run_case(2, 16, 16, 12, 32, k2)
    print("KERNEL_OK")
</pallas_src>

<mosaic_0001>
module attributes {stable_mosaic.version = 11 : i64} {
  func.func @_pw_kernel(%arg0: i32, %arg1: i32, %arg2: memref<512x64xbf16, #tpu.memory_space<vmem>>, %arg3: memref<64x256xbf16, #tpu.memory_space<vmem>>, %arg4: memref<1x256xf32, #tpu.memory_space<vmem>>, %arg5: memref<1x256xf32, #tpu.memory_space<vmem>>, %arg6: memref<512x256xbf16, #tpu.memory_space<vmem>>) attributes {dimension_semantics = [#tpu.dimension_semantics<parallel>, #tpu.dimension_semantics<parallel>], iteration_bounds = array<i64: 2, 2>, scalar_prefetch = 0 : i64, scratch_operands = 0 : i64, tpu.core_type = #tpu.core_type<tc>, window_params = [{transform_indices = @transform_0, window_bounds = array<i64: 512, 64>}, {transform_indices = @transform_1, window_bounds = array<i64: 64, 256>}, {transform_indices = @transform_2, window_bounds = array<i64: 1, 256>}, {transform_indices = @transform_3, window_bounds = array<i64: 1, 256>}, {transform_indices = @transform_4, window_bounds = array<i64: 512, 256>}]} {
    %c0 = arith.constant 0 : index
    %c0_0 = arith.constant 0 : index
    %0 = vector.load %arg2[%c0, %c0_0] : memref<512x64xbf16, #tpu.memory_space<vmem>>, vector<512x64xbf16>
    %c0_1 = arith.constant 0 : index
    %c0_2 = arith.constant 0 : index
    %1 = vector.load %arg3[%c0_1, %c0_2] : memref<64x256xbf16, #tpu.memory_space<vmem>>, vector<64x256xbf16>
    %cst = arith.constant dense<0.000000e+00> : vector<512x256xf32>
    %2 = tpu.matmul %0, %1, %cst {dimension_numbers = #tpu.dot_dimension_numbers<[1], [0], [0], [1], [0, 0, 1, 1], [], []>} : vector<512x64xbf16>, vector<64x256xbf16>, vector<512x256xf32> -> vector<512x256xf32>
    %cst_3 = arith.constant 5.000000e-01 : f32
    %3 = vector.broadcast %cst_3 : f32 to vector<512x256xf32>
    %4 = arith.mulf %3, %2 : vector<512x256xf32>
    %cst_4 = arith.constant 0.707106769 : f32
    %5 = vector.broadcast %cst_4 : f32 to vector<512x256xf32>
    %6 = arith.mulf %2, %5 : vector<512x256xf32>
    %7 = math.erf %6 : vector<512x256xf32>
    %cst_5 = arith.constant 1.000000e+00 : f32
    %8 = vector.broadcast %cst_5 : f32 to vector<512x256xf32>
    %9 = arith.addf %8, %7 : vector<512x256xf32>
    %10 = arith.mulf %4, %9 : vector<512x256xf32>
    %c0_6 = arith.constant 0 : index
    %c0_7 = arith.constant 0 : index
    %11 = vector.load %arg4[%c0_6, %c0_7] : memref<1x256xf32, #tpu.memory_space<vmem>>, vector<1x256xf32>
    %12 = vector.broadcast %11 : vector<1x256xf32> to vector<512x256xf32>
    %13 = arith.mulf %10, %12 : vector<512x256xf32>
    %c0_8 = arith.constant 0 : index
    %c0_9 = arith.constant 0 : index
    %14 = vector.load %arg5[%c0_8, %c0_9] : memref<1x256xf32, #tpu.memory_space<vmem>>, vector<1x256xf32>
    %15 = vector.broadcast %14 : vector<1x256xf32> to vector<512x256xf32>
    %16 = arith.addf %13, %15 : vector<512x256xf32>
    %17 = arith.truncf %16 : vector<512x256xf32> to vector<512x256xbf16>
    %c0_10 = arith.constant 0 : index
    %c0_11 = arith.constant 0 : index
    %18 = vector.load %arg6[%c0_10, %c0_11] : memref<512x256xbf16, #tpu.memory_space<vmem>>, vector<512x256xbf16>
    tpu.vector_store %arg6[%c0_10, %c0_11], %17 {strides = array<i32>} : memref<512x256xbf16, #tpu.memory_space<vmem>>, vector<512x256xbf16>,
    return
  }
  func.func @transform_0(%arg0: i32, %arg1: i32) -> (i32, i32) {
    %c0_i32 = arith.constant 0 : i32
    %c0_i32_0 = arith.constant 0 : i32
    return %arg0, %c0_i32 : i32, i32
  }
  func.func @transform_1(%arg0: i32, %arg1: i32) -> (i32, i32) {
    %c0_i32 = arith.constant 0 : i32
    %c0_i32_0 = arith.constant 0 : i32
    return %c0_i32, %arg1 : i32, i32
  }
  func.func @transform_2(%arg0: i32, %arg1: i32) -> (i32, i32) {
    %c0_i32 = arith.constant 0 : i32
    %c0_i32_0 = arith.constant 0 : i32
    return %c0_i32, %arg1 : i32, i32
  }
  func.func @transform_3(%arg0: i32, %arg1: i32) -> (i32, i32) {
    %c0_i32 = arith.constant 0 : i32
    %c0_i32_0 = arith.constant 0 : i32
    return %c0_i32, %arg1 : i32, i32
  }
  func.func @transform_4(%arg0: i32, %arg1: i32) -> (i32, i32) {
    %c0_i32 = arith.constant 0 : i32
    return %arg0, %arg1 : i32, i32
  }
}

</mosaic_0001>

<bundles_post_ra>
// kernel: tpu_custom_call.1
= control target key start
LH: loop header
LB: loop body
LE: loop exit
PB: predicated region body
PF: predicated region fallthrough
CT: control target
= control target key end

     0   :  { %9 = vsyncpa [#allocation4], 0  ;;  %s4796_s0 = inlined_call_operand.vmem [shape: bf16[640,64], index: 0, kind: input, shape index: {}]   ;;  %s4797_s1 = inlined_call_operand.vmem [shape: bf16[64,512], index: 1, kind: input, shape index: {}]   ;;  %s4798_s2 = inlined_call_operand.vmem [shape: f32[1,512], index: 2, kind: input, shape index: {}]   ;;  %s4799_s3 = inlined_call_operand.vmem [shape: f32[1,512], index: 3, kind: input, shape index: {}]   ;;  %s4800_s4 = inlined_call_operand.hbm [shape: bf16[640,512], index: 4, kind: output, shape index: {}]  }
   0x1   :  { %11 = vsyncpa [#allocation4 + $0x1], 0  ;;  %s3357_s15 = smov 0   ;;  %s3359_s16 = smov 0  }
   0x2   :  { %s3361_s17 = smov 0   ;;  %s3363_s18 = smov 0  }
   0x3   :  { %s3365_s19 = smov 0   ;;  %s3367_s20 = smov 0  }
   0x4   :  { %s3369_s21 = smov 0   ;;  %s3371_s22 = smov 0  }
   0x5   :  { %s3373_s23 = smov 0   ;;  %s3375_s24 = smov 0  }
   0x6 LB: > { %s2588_s25 = sadd.s32 4294967295, %s3325_s24   ;;  %s2589_s26 = sadd.s32 4294967294, %s3325_s24   ;;  %s3325_s24 = sphi %s3375_s24, %s17_s24   ;;  %s3321_s23 = sphi %s3373_s23, %s4926_s23   ;;  %s3317_s22 = sphi %s3371_s22, %s4925_s22   ;;  %s3313_s21 = sphi %s3369_s21, %s4924_s21   ;;  %s3309_s20 = sphi %s3367_s20, %s4923_s20   ;;  %s3305_s19 = sphi %s3365_s19, %s4922_s19   ;;  %s3301_s18 = sphi %s3363_s18, %s4921_s18   ;;  %s3297_s17 = sphi %s3361_s17, %s4920_s17   ;;  %s3293_s16 = sphi %s3359_s16, %s4919_s16   ;;  %s3289_s15 = sphi %s3357_s15, %s4918_s15  }
   0x7   : > { %s26_s27 = sadd.s32 1, %s3317_s22  ;;  %s29_s28 = sadd.s32 1, %s3321_s23 }
   0x8   : > { %p27_p0 = scmp.ge.s32.totalorder %s26_s27, 2  ;;  %s62_s29 = sadd.s32 1, %s3305_s19 }
   0x9   : > { %p69_p1 = scmp.ne.s32.totalorder %s3305_s19, %s3301_s18  ;;  %p70_p2 = scmp.eq.s32.totalorder %s3325_s24, 0 }
   0xa   : > { %s4928_s27 = smov (%p27_p0, %s26_s27), 0  ;;  %s4930_s28 = smov (!%p27_p0, %s29_s28), %s3321_s23 }
   0xb   : > { %s59_s30 = ssub.s32 %s3317_s22, %s4928_s27  ;;  %p3420_p3 = por %p70_p2, %p69_p1 }
   0xc   : > { %p31_p4 = scmp.ge.s32.totalorder %s4930_s28, 2  ;;  %p60_p5 = scmp.eq.s32.totalorder %s59_s30, 0 }
   0xd   : > { %s142_s6 = sadd.s32 1, %s3297_s17  ;;  %p152_p6 = scmp.ne.s32.totalorder %s3297_s17, %s3293_s16 }
   0xe   : > { %s4932_s28 = smov (%p31_p4, %s4930_s28), 0  ;;  %p153_p7 = scmp.eq.s32.totalorder %s2588_s25, 3 }
   0xf   : > { %s3430_s7 = scalar_select %p60_p5, %s3305_s19, %s62_s29  }
  0x10   : > { %s137_s8 = ssub.s32 %s3321_s23, %s4932_s28  ;;  %p158_p8 = scmp.ne.s32.totalorder %s3293_s16, %s3289_s15 }
  0x11   : > { %s139_s9 = sor.u32 %s137_s8, %s59_s30  ;;  %p3436_p10 = por %p153_p7, %p152_p6 }
  0x12   : > { %p140_p9 = scmp.eq.s32.totalorder %s139_s9, 0  ;;  %p159_p11 = scmp.eq.s32.totalorder %s2589_s26, 3 }
  0x13   : > { %p2591_p13 = scmp.ge.s32.totalorder %s3325_s24, 4 }
  0x14   : > { %s3441_s11 = scalar_select %p140_p9, %s3297_s17, %s142_s6  }
  0x15   : > { %p3443_p12 = por %p159_p11, %p158_p8  ;;  %175 = sbr.rel (%p2591_p13) target bundleno = 36 (0x24), region = 16 }
  0x1c   : > { %195 = sbr.rel (!%p3420_p3) target bundleno = 36 (0x24), region = 24  ;;  %s197_s13 = sand.u32 (%p3420_p3), 1, %s3305_s19  }
  0x1d   : > { %s2750_s14 = sshll.u32 (%p3420_p3), %s3317_s22, 3  ;;  %s2592_s25 = sshll.u32 (%p3420_p3), %s197_s13, 6 }
  0x1e   : > { %s202_s26 = scalar_lea.vmem (%p3420_p3), %s4797_s1, %s2750_s14  ;;  %s199_s6 = scalar_lea.vmem (%p3420_p3), [#allocation2], %s2592_s25 }
  0x1f   : > { %v244_v0 = vld [vmem:[%s202_s26] sm:$0xff] (%p3420_p3)  ;;  %v246_v1 = vld [vmem:[%s202_s26 + $0x10] sm:$0xff] (%p3420_p3) }
  0x20   : > { %v248_v2 = vld [vmem:[%s202_s26 + $0x20] sm:$0xff] (%p3420_p3)  ;;  %245 = vst [vmem:[%s199_s6] sm:$0xff] (%p3420_p3), %v244_v0  ;;  %247 = vst [vmem:[%s199_s6 + $0x8] sm:$0xff] (%p3420_p3), %v246_v1  ;;  %v250_v3 = vld [vmem:[%s202_s26 + $0x30] sm:$0xff] (%p3420_p3) }
  0x21   : > { %249 = vst [vmem:[%s199_s6 + $0x10] sm:$0xff] (%p3420_p3), %v248_v2  ;;  %v252_v4 = vld [vmem:[%s202_s26 + $0x40] sm:$0xff] (%p3420_p3)  ;;  %v254_v5 = vld [vmem:[%s202_s26 + $0x50] sm:$0xff] (%p3420_p3)  ;;  %251 = vst [vmem:[%s199_s6 + $0x18] sm:$0xff] (%p3420_p3), %v250_v3 }
  0x22   : > { %253 = vst [vmem:[%s199_s6 + $0x20] sm:$0xff] (%p3420_p3), %v252_v4  ;;  %255 = vst [vmem:[%s199_s6 + $0x28] sm:$0xff] (%p3420_p3), %v254_v5  ;;  %v256_v6 = vld [vmem:[%s202_s26 + $0x60] sm:$0xff] (%p3420_p3)  ;;  %v258_v7 = vld [vmem:[%s202_s26 + $0x70] sm:$0xff] (%p3420_p3) }
  0x23   : > { %257 = vst [vmem:[%s199_s6 + $0x30] sm:$0xff] %v256_v6  ;;  %259 = vst [vmem:[%s199_s6 + $0x38] sm:$0xff] %v258_v7 }
  0x24 PF: > { %p2595_p0 = scmp.ge.s32.totalorder %s3325_s24, 1  ;;  %p280_p1 = scmp.lt.s32.totalorder %s3325_s24, 5 }
  0x26   : > { %p281_p2 = pnand %p2595_p0, %p280_p1 }
  0x28   : > { %284 = sbr.rel (%p281_p2) target bundleno = 570 (0x23a), region = 70 }
  0x2f   : > { %s287_s5 = sand.u32 1, %s3301_s18   ;;  %s3459_s8 = sshll.u32 %s3313_s21, 6  ;;  %v3327_v8 = vmov 0   ;;  %vm634_vm0 = vcmask 523264   ;;  %v1726_v49 = vlaneseq }
  0x30   : > { %s2596_s9 = sshll.u32 %s287_s5, 6  ;;  %763 = vmatprep.mubr.bf16.mxu0 %v3327_v8  ;;  %923 = vmatprep.mubr.bf16.mxu1 %v3327_v8  ;;  %p334_p3 = scmp.lt.s32.totalorder %s3459_s8, 79 }
  0x31   : > { %s289_s13 = scalar_lea.vmem [#allocation2], %s2596_s9  ;;  %s3565_s26 = sshll.u32 %s3309_s20, 1  ;;  %v1727_v50 = vshrl.u32 %v1726_v49, 7 }
  0x32   : > { %v2915_v9 = vld [vmem:[%s289_s13 + $0x4] ss:$8 sps:$4 sm:$0xff]   ;;  %s335_s14 = scalar_select %p334_p3, %s3459_s8, 79  ;;  %v2917_v10 = vld [vmem:[%s289_s13] ss:$8 sps:$4 sm:$0xff]  }
  0x33   : > { %731 = vmatprep.subr.bf16.mxu0 %v2915_v9  ;;  %2817 = vmatprep.subr.bf16.mxu1 %v2915_v9  ;;  %v2918_v11 = vld [vmem:[%s289_s13 + $0x14] ss:$8 sps:$4 sm:$0xff]   ;;  %v2920_v12 = vld [vmem:[%s289_s13 + $0x10] ss:$8 sps:$4 sm:$0xff]   ;;  %v2921_v13 = vld [vmem:[%s289_s13 + $0x24] ss:$8 sps:$4 sm:$0xff]  }
  0x34   : > { %s2599_s25 = sshll.u32 %s335_s14, 2  ;;  %732 = vmatpush1.bf16.msra.mxu0 %v2917_v10  ;;  %2821 = vmatpush1.bf16.msra.mxu1 %v2917_v10  ;;  %v2923_v14 = vld [vmem:[%s289_s13 + $0x20] ss:$8 sps:$4 sm:$0xff]   ;;  %v2924_v15 = vld [vmem:[%s289_s13 + $0x34] ss:$8 sps:$4 sm:$0xff]   ;;  %p345_p4 = scmp.lt.s32.totalorder %s3565_s26, 3 }
  0x35   : > { %733 = vmatprep.subr.bf16.mxu0 %v2918_v11  ;;  %2818 = vmatprep.subr.bf16.mxu1 %v2918_v11  ;;  %s3468_s30 = scalar_lea.vmem %s4796_s0, %s2599_s25  ;;  %v2926_v16 = vld [vmem:[%s289_s13 + $0x30] ss:$8 sps:$4 sm:$0xff]   ;;  %v1728_v54 = vsub.s32 0, %v1727_v50  ;;  %v1732_v58 = vsub.s32 1, %v1727_v50  ;;  %s326_s20 = sand.u32 1, %s3293_s16  }
  0x36   : > { %v2927_v17 = vld [vmem:[%s3468_s30] sm:$0xff]   ;;  %v2929_v19 = vld [vmem:[%s3468_s30 + $0x8] sm:$0xff]   ;;  %v2931_v21 = vld [vmem:[%s3468_s30 + $0x10] sm:$0xff]   ;;  %s346_s6 = scalar_select %p345_p4, %s3565_s26, 3 }
  0x37   : > { %v2928_v18 = vld [vmem:[%s3468_s30 + $0x80] sm:$0xff]   ;;  %v2930_v20 = vld [vmem:[%s3468_s30 + $0x88] sm:$0xff]   ;;  %v2932_v22 = vld [vmem:[%s3468_s30 + $0x90] sm:$0xff]   ;;  %s3634_s29 = sshll.u32 %s326_s20, 9  ;;  %s2462_s5 = ssub.s32 (%p3436_p10), 80, %s3459_s8 }
  0x38   : > { %734 = vmatpush1.bf16.msra.mxu0 %v2920_v12  ;;  %2822 = vmatpush1.bf16.msra.mxu1 %v2920_v12  ;;  %v2933_v23 = vld [vmem:[%s3468_s30 + $0x18] sm:$0xff]   ;;  %v2935_v25 = vld [vmem:[%s3468_s30 + $0x20] sm:$0xff]   ;;  %v2937_v27 = vld [vmem:[%s3468_s30 + $0x28] sm:$0xff]   ;;  %s347_s13 = scalar_lea.vmem %s4798_s2, %s346_s6  ;;  %s352_s18 = scalar_lea.vmem %s4799_s3, %s346_s6 }
  0x39   : > { %735 = vmatprep.subr.bf16.mxu0 %v2921_v13  ;;  %2819 = vmatprep.subr.bf16.mxu1 %v2921_v13  ;;  %v2934_v24 = vld [vmem:[%s3468_s30 + $0x98] sm:$0xff]   ;;  %v2936_v26 = vld [vmem:[%s3468_s30 + $0xa0] sm:$0xff]   ;;  %v2938_v28 = vld [vmem:[%s3468_s30 + $0xa8] sm:$0xff]   ;;  %s4717_s6 = scalar_lea.sflag [#allocation4], %s326_s20  ;;  %p2463_p5 = scmp.lt.s32.totalorder (%p3436_p10), %s2462_s5, 64 }
  0x3a   : > { %v2939_v29 = vld [vmem:[%s3468_s30 + $0x30] sm:$0xff]   ;;  %v2941_v31 = vld [vmem:[%s3468_s30 + $0x38] sm:$0xff]   ;;  %v2943_v33 = vld [vmem:[%s3468_s30 + $0x40] sm:$0xff]  }
  0x3b   : > { %v2940_v30 = vld [vmem:[%s3468_s30 + $0xb0] sm:$0xff]   ;;  %v2942_v32 = vld [vmem:[%s3468_s30 + $0xb8] sm:$0xff]   ;;  %v2944_v34 = vld [vmem:[%s3468_s30 + $0xc0] sm:$0xff]  }
  0x3c   : > { %736 = vmatpush1.bf16.msra.mxu0 %v2923_v14  ;;  %2823 = vmatpush1.bf16.msra.mxu1 %v2923_v14  ;;  %v2945_v35 = vld [vmem:[%s3468_s30 + $0x48] sm:$0xff]   ;;  %v2947_v37 = vld [vmem:[%s3468_s30 + $0x50] sm:$0xff]   ;;  %v2949_v39 = vld [vmem:[%s3468_s30 + $0x58] sm:$0xff]  }
  0x3d   : > { %737 = vmatprep.subr.bf16.mxu0 %v2924_v15  ;;  %2820 = vmatprep.subr.bf16.mxu1 %v2924_v15  ;;  %v2946_v36 = vld [vmem:[%s3468_s30 + $0xc8] sm:$0xff]   ;;  %v2948_v38 = vld [vmem:[%s3468_s30 + $0xd0] sm:$0xff]   ;;  %v2950_v40 = vld [vmem:[%s3468_s30 + $0xd8] sm:$0xff]  }
  0x3e   : > { %v2951_v41 = vld [vmem:[%s3468_s30 + $0x60] sm:$0xff]   ;;  %v2953_v43 = vld [vmem:[%s3468_s30 + $0x68] sm:$0xff]   ;;  %v2955_v45 = vld [vmem:[%s3468_s30 + $0x70] sm:$0xff]  }
  0x3f   : > { %v2952_v42 = vld [vmem:[%s3468_s30 + $0xe0] sm:$0xff]   ;;  %v2954_v44 = vld [vmem:[%s3468_s30 + $0xe8] sm:$0xff]   ;;  %v2956_v46 = vld [vmem:[%s3468_s30 + $0xf0] sm:$0xff]  }
  0x40   : > { %738 = vmatpush1.bf16.msra.mxu0 %v2926_v16  ;;  %2824 = vmatpush1.bf16.msra.mxu1 %v2926_v16  ;;  %v2957_v47 = vld [vmem:[%s3468_s30 + $0x78] sm:$0xff]   ;;  %v1724_v56 = vld [vmem:[%s347_s13] sm:$0x3] }
  0x41   : > { %v2958_v48 = vld [vmem:[%s3468_s30 + $0xf8] sm:$0xff]   ;;  %v1864_v60 = vld [vmem:[%s352_s18] sm:$0x3]  ;;  %v3575_v3 = vrot.slane %v1724_v56, %v1728_v54  ;;  %v3579_v10 = vrot.slane %v1724_v56, %v1732_v58  ;;  %s3662_s30 = scalar_lea.vmem [#allocation3], %s3634_s29 }
  0x42   : > { %v3577_v6 = vrot.slane %v1864_v60, %v1728_v54  ;;  %v3581_v11 = vrot.slane %v1864_v60, %v1732_v58 }
  0x43   : > { %2642 = vmatmul.mubr.msk.bf16.vlgmr.msra.gmra.mrb[0].mxu0 %vm634_vm0, %v2927_v17  ;;  %2658 = vmatmul.mubr.msk.bf16.vlgmr.msra.gmra.mrb[0].mxu1 %vm634_vm0, %v2928_v18 }
  0x44   : > { %773 = vmatprep.mubr.bf16.mxu0 %v3327_v8  ;;  %933 = vmatprep.mubr.bf16.mxu1 %v3327_v8 }
  0x4b   : > { %2643 = vmatmul.mubr.msk.bf16.gmra.mrb[4].mxu0 %vm634_vm0, %v2929_v19  ;;  %2659 = vmatmul.mubr.msk.bf16.gmra.mrb[4].mxu1 %vm634_vm0, %v2930_v20 }
  0x4c   : > { %783 = vmatprep.mubr.bf16.mxu0 %v3327_v8  ;;  %943 = vmatprep.mubr.bf16.mxu1 %v3327_v8 }
  0x53   : > { %2644 = vmatmul.mubr.msk.bf16.gmra.mrb[8].mxu0 %vm634_vm0, %v2931_v21  ;;  %2660 = vmatmul.mubr.msk.bf16.gmra.mrb[8].mxu1 %vm634_vm0, %v2932_v22 }
  0x54   : > { %793 = vmatprep.mubr.bf16.mxu0 %v3327_v8  ;;  %953 = vmatprep.mubr.bf16.mxu1 %v3327_v8 }
  0x5b   : > { %2645 = vmatmul.mubr.msk.bf16.gmra.mrb[12].mxu0 %vm634_vm0, %v2933_v23  ;;  %2661 = vmatmul.mubr.msk.bf16.gmra.mrb[12].mxu1 %vm634_vm0, %v2934_v24 }
  0x5c   : > { %803 = vmatprep.mubr.bf16.mxu0 %v3327_v8  ;;  %963 = vmatprep.mubr.bf16.mxu1 %v3327_v8 }
  0x63   : > { %2646 = vmatmul.mubr.msk.bf16.gmra.mrb[16].mxu0 %vm634_vm0, %v2935_v25  ;;  %2662 = vmatmul.mubr.msk.bf16.gmra.mrb[16].mxu1 %vm634_vm0, %v2936_v26 }
  0x64   : > { %813 = vmatprep.mubr.bf16.mxu0 %v3327_v8  ;;  %973 = vmatprep.mubr.bf16.mxu1 %v3327_v8 }
  0x6b   : > { %2647 = vmatmul.mubr.msk.bf16.gmra.mrb[20].mxu0 %vm634_vm0, %v2937_v27  ;;  %2663 = vmatmul.mubr.msk.bf16.gmra.mrb[20].mxu1 %vm634_vm0, %v2938_v28 }
  0x6c   : > { %823 = vmatprep.mubr.bf16.mxu0 %v3327_v8  ;;  %983 = vmatprep.mubr.bf16.mxu1 %v3327_v8 }
  0x73   : > { %2648 = vmatmul.mubr.msk.bf16.gmra.mrb[24].mxu0 %vm634_vm0, %v2939_v29  ;;  %2664 = vmatmul.mubr.msk.bf16.gmra.mrb[24].mxu1 %vm634_vm0, %v2940_v30 }
  0x74   : > { %833 = vmatprep.mubr.bf16.mxu0 %v3327_v8  ;;  %993 = vmatprep.mubr.bf16.mxu1 %v3327_v8 }
  0x7b   : > { %2649 = vmatmul.mubr.msk.bf16.gmra.mrb[28].mxu0 %vm634_vm0, %v2941_v31  ;;  %2665 = vmatmul.mubr.msk.bf16.gmra.mrb[28].mxu1 %vm634_vm0, %v2942_v32 }
  0x7c   : > { %843 = vmatprep.mubr.bf16.mxu0 %v3327_v8  ;;  %1003 = vmatprep.mubr.bf16.mxu1 %v3327_v8 }
  0x83   : > { %2650 = vmatmul.mubr.msk.bf16.gmra.mrb[32].mxu0 %vm634_vm0, %v2943_v33  ;;  %2666 = vmatmul.mubr.msk.bf16.gmra.mrb[32].mxu1 %vm634_vm0, %v2944_v34 }
  0x84   : > { %853 = vmatprep.mubr.bf16.mxu0 %v3327_v8  ;;  %1013 = vmatprep.mubr.bf16.mxu1 %v3327_v8 }
  0x8b   : > { %2651 = vmatmul.mubr.msk.bf16.gmra.mrb[36].mxu0 %vm634_vm0, %v2945_v35  ;;  %2667 = vmatmul.mubr.msk.bf16.gmra.mrb[36].mxu1 %vm634_vm0, %v2946_v36 }
  0x8c   : > { %863 = vmatprep.mubr.bf16.mxu0 %v3327_v8  ;;  %1023 = vmatprep.mubr.bf16.mxu1 %v3327_v8 }
  0x93   : > { %2652 = vmatmul.mubr.msk.bf16.gmra.mrb[40].mxu0 %vm634_vm0, %v2947_v37  ;;  %2668 = vmatmul.mubr.msk.bf16.gmra.mrb[40].mxu1 %vm634_vm0, %v2948_v38 }
  0x94   : > { %873 = vmatprep.mubr.bf16.mxu0 %v3327_v8  ;;  %1033 = vmatprep.mubr.bf16.mxu1 %v3327_v8 }
  0x9b   : > { %2653 = vmatmul.mubr.msk.bf16.gmra.mrb[44].mxu0 %vm634_vm0, %v2949_v39  ;;  %2669 = vmatmul.mubr.msk.bf16.gmra.mrb[44].mxu1 %vm634_vm0, %v2950_v40 }
  0x9c   : > { %883 = vmatprep.mubr.bf16.mxu0 %v3327_v8  ;;  %1043 = vmatprep.mubr.bf16.mxu1 %v3327_v8 }
  0xa3   : > { %2654 = vmatmul.mubr.msk.bf16.gmra.mrb[48].mxu0 %vm634_vm0, %v2951_v41  ;;  %2670 = vmatmul.mubr.msk.bf16.gmra.mrb[48].mxu1 %vm634_vm0, %v2952_v42 }
  0xa4   : > { %893 = vmatprep.mubr.bf16.mxu0 %v3327_v8  ;;  %1053 = vmatprep.mubr.bf16.mxu1 %v3327_v8 }
  0xab   : > { %2655 = vmatmul.mubr.msk.bf16.gmra.mrb[52].mxu0 %vm634_vm0, %v2953_v43  ;;  %2671 = vmatmul.mubr.msk.bf16.gmra.mrb[52].mxu1 %vm634_vm0, %v2954_v44 }
  0xac   : > { %903 = vmatprep.mubr.bf16.mxu0 %v3327_v8  ;;  %1063 = vmatprep.mubr.bf16.mxu1 %v3327_v8 }
  0xb3   : > { %2656 = vmatmul.mubr.msk.bf16.gmra.mrb[56].mxu0 %vm634_vm0, %v2955_v45  ;;  %2672 = vmatmul.mubr.msk.bf16.gmra.mrb[56].mxu1 %vm634_vm0, %v2956_v46 }
  0xb4   : > { %913 = vmatprep.mubr.bf16.mxu0 %v3327_v8  ;;  %1073 = vmatprep.mubr.bf16.mxu1 %v3327_v8 }
  0xbb   : > { %2657 = vmatmul.mubr.msk.bf16.gmra.mrb[60].mxu0 %vm634_vm0, %v2957_v47  ;;  %2673 = vmatmul.mubr.msk.bf16.gmra.mrb[60].mxu1 %vm634_vm0, %v2958_v48 }
 0x116   : > { %v765_v51 = vpop.f32.mrb[0].mxu0  ;;  %v925_v52 = vpop.f32.mrb[0].mxu1 }
 0x117   : > { %v1212_v53 = vmul.f32 0.70710677, %v765_v51  ;;  %v1276_v55 = vmul.f32 0.70710677, %v925_v52  ;;  %v767_v57 = vpop.f32.mrb[1].mxu0  ;;  %v927_v59 = vpop.f32.mrb[1].mxu1 }
 0x118   : > { %v1213_v61 = vmul.f32 0.70710677, %v767_v57  ;;  %v769_v62 = vpop.f32.mrb[2].mxu0  ;;  %v929_v63 = vpop.f32.mrb[2].mxu1  ;;  %v1277_v0 = vmul.f32 0.70710677, %v927_v59 }
 0x119   : > { %2959 = verf.f32 %v1212_v53  ;;  %v1214_v1 = vmul.f32 0.70710677, %v769_v62  ;;  %v771_v2 = vpop.f32.mrb[3].mxu0  ;;  %v1278_v4 = vmul.f32 0.70710677, %v929_v63  ;;  %v931_v5 = vpop.f32.mrb[3].mxu1 }
 0x11a   : > { %2961 = verf.f32 %v1276_v55  ;;  %v1215_v7 = vmul.f32 0.70710677, %v771_v2  ;;  %v1279_v8 = vmul.f32 0.70710677, %v931_v5  ;;  %v1084_v9 = vmul.f32 0.5, %v765_v51 }
 0x11b   : > { %2963 = verf.f32 %v1213_v61  ;;  %v1148_v12 = vmul.f32 0.5, %v925_v52  ;;  %v1085_v13 = vmul.f32 0.5, %v767_v57  ;;  %v3583_v14 = vmul.f32 0.5, %v927_v59 }
 0x11c   : > { %2965 = verf.f32 %v1277_v0  ;;  %v3585_v17 = vmul.f32 0.5, %v769_v62  ;;  %v3587_v18 = vmul.f32 0.5, %v929_v63  ;;  %v3589_v22 = vmul.f32 0.5, %v771_v2 }
 0x11d   : > { %2967 = verf.f32 %v1214_v1  ;;  %v3591_v26 = vmul.f32 0.5, %v931_v5 }
 0x11e   : > { %2969 = verf.f32 %v1278_v4  ;;  %v775_v15 = vpop.f32.mrb[4].mxu0  ;;  %v935_v16 = vpop.f32.mrb[4].mxu1 }
 0x11f   : > { %2971 = verf.f32 %v1215_v7  ;;  %v1216_v19 = vmul.f32 0.70710677, %v775_v15  ;;  %v777_v20 = vpop.f32.mrb[5].mxu0  ;;  %v937_v21 = vpop.f32.mrb[5].mxu1  ;;  %v1280_v23 = vmul.f32 0.70710677, %v935_v16 }
 0x120   : > { %2973 = verf.f32 %v1279_v8  ;;  %v1217_v24 = vmul.f32 0.70710677, %v777_v20  ;;  %v779_v25 = vpop.f32.mrb[6].mxu0  ;;  %v3593_v27 = vmul.f32 0.5, %v775_v15  ;;  %v1281_v28 = vmul.f32 0.70710677, %v937_v21 }
 0x121   : > { %2975 = verf.f32 %v1216_v19  ;;  %v939_v29 = vpop.f32.mrb[6].mxu1  ;;  %v781_v30 = vpop.f32.mrb[7].mxu0  ;;  %v3595_v31 = vmul.f32 0.5, %v935_v16  ;;  %v1218_v32 = vmul.f32 0.70710677, %v779_v25  ;;  %v3597_v36 = vmul.f32 0.5, %v777_v20 }
 0x122   : > { %2977 = verf.f32 %v1280_v23  ;;  %v1282_v33 = vmul.f32 0.70710677, %v939_v29  ;;  %v941_v34 = vpop.f32.mrb[7].mxu1  ;;  %v3599_v37 = vmul.f32 0.5, %v937_v21  ;;  %v1219_v38 = vmul.f32 0.70710677, %v781_v30 }
 0x123   : > { %v2960_v35 = vpop.eup %2959  ;;  %2979 = verf.f32 %v1217_v24  ;;  %v3601_v41 = vmul.f32 0.5, %v779_v25  ;;  %v1283_v42 = vmul.f32 0.70710677, %v941_v34  ;;  %v3603_v45 = vmul.f32 0.5, %v939_v29 }
 0x124   : > { %v2962_v39 = vpop.eup %2961  ;;  %v1468_v40 = vadd.f32 1.0, %v2960_v35  ;;  %2981 = verf.f32 %v1281_v28  ;;  %v3605_v46 = vmul.f32 0.5, %v781_v30  ;;  %v3607_v50 = vmul.f32 0.5, %v941_v34 }
 0x125   : > { %v2964_v43 = vpop.eup %2963  ;;  %v1532_v44 = vadd.f32 1.0, %v2962_v39  ;;  %2983 = verf.f32 %v1218_v32 }
 0x126   : > { %v2966_v47 = vpop.eup %2965  ;;  %v1596_v48 = vmul.f32 %v1468_v40, %v1084_v9  ;;  %v1469_v49 = vadd.f32 1.0, %v2964_v43  ;;  %2985 = verf.f32 %v1282_v33  ;;  %v785_v51 = vpop.f32.mrb[8].mxu0 }
 0x127   : > { %v3609_v52 = vpop.f32.mrb[8].mxu1  ;;  %v2968_v53 = vpop.eup %2967  ;;  %v1660_v54 = vmul.f32 %v1532_v44, %v1148_v12  ;;  %v1533_v55 = vadd.f32 1.0, %v2966_v47  ;;  %2987 = verf.f32 %v1219_v38  ;;  %v3612_v56 = vmul.f32 0.5, %v785_v51 }
 0x128   : > { %v3614_v57 = vpop.f32.mrb[9].mxu0  ;;  %v3616_v58 = vpop.f32.mrb[9].mxu1  ;;  %v1736_v60 = vmul.f32 %v3575_v3, %v1596_v48  ;;  %v1597_v61 = vmul.f32 %v1469_v49, %v1085_v13  ;;  %v1470_v62 = vadd.f32 1.0, %v2968_v53  ;;  %2989 = verf.f32 %v1283_v42 }
 0x129   : > { %v2970_v59 = vpop.eup %2969  ;;  %v3619_v63 = vpop.f32.mrb[10].mxu0  ;;  %v1800_v2 = vmul.f32 %v3575_v3, %v1660_v54  ;;  %v1661_v4 = vmul.f32 %v1533_v55, %v3583_v14  ;;  %v3625_v7 = vmul.f32 0.70710677, %v785_v51 }
 0x12a   : > { %v3621_v0 = vpop.f32.mrb[10].mxu1  ;;  %v2972_v1 = vpop.eup %2971  ;;  %v1534_v5 = vadd.f32 1.0, %v2970_v59  ;;  %v1876_v13 = vadd.f32 %v3577_v6, %v1736_v60  ;;  %v1737_v15 = vmul.f32 %v3579_v10, %v1597_v61  ;;  %v1598_v16 = vmul.f32 %v1470_v62, %v3585_v17 }
 0x12b   : > { %v3627_v8 = vpop.f32.mrb[11].mxu0  ;;  %v3629_v9 = vpop.f32.mrb[11].mxu1  ;;  %v1471_v19 = vadd.f32 1.0, %v2972_v1  ;;  %v1940_v14 = vadd.f32 %v3577_v6, %v1800_v2  ;;  %v1801_v21 = vmul.f32 %v3579_v10, %v1661_v4  ;;  %2991 = verf.f32 %v3625_v7 }
 0x12c   : > { %v2974_v12 = vpop.eup %2973  ;;  %v1662_v23 = vmul.f32 %v1534_v5, %v3587_v18  ;;  %v1877_v28 = vadd.f32 %v3581_v11, %v1737_v15  ;;  %v1738_v29 = vmul.f32 %v3575_v3, %v1598_v16  ;;  %v1284_v7 = vmul.f32 0.70710677, %v3609_v52 }
 0x12d   : > { %v2976_v20 = vpop.eup %2975  ;;  %v1535_v24 = vadd.f32 1.0, %v2974_v12  ;;  %v1599_v30 = vmul.f32 %v1471_v19, %v3589_v22  ;;  %v1941_v17 = vadd.f32 %v3581_v11, %v1801_v21 }
 0x12e   : > { %v2978_v25 = vpop.eup %2977  ;;  %v1472_v32 = vadd.f32 1.0, %v2976_v20  ;;  %v1802_v34 = vmul.f32 %v3575_v3, %v1662_v23  ;;  %v2751_v18 = vpack.c.bf16 %v1877_v28, %v1876_v13  ;;  %v1878_v40 = vadd.f32 %v3577_v6, %v1738_v29  ;;  %v3650_v44 = vpop.f32.mrb[12].mxu0 }
 0x12f   : > { %v2980_v33 = vpop.eup %2979  ;;  %v1663_v35 = vmul.f32 %v1535_v24, %v3591_v26  ;;  %v1536_v38 = vadd.f32 1.0, %v2978_v25  ;;  %v1739_v42 = vmul.f32 %v3579_v10, %v1599_v30  ;;  %v3652_v22 = vpop.f32.mrb[12].mxu1  ;;  %v2783_v48 = vpack.c.bf16 %v1941_v17, %v1940_v14 }
 0x130   : > { %v2982_v39 = vpop.eup %2981  ;;  %v1600_v43 = vmul.f32 %v1472_v32, %v3593_v27  ;;  %v1942_v49 = vadd.f32 %v3577_v6, %v1802_v34  ;;  %v3657_v53 = vpop.f32.mrb[13].mxu0  ;;  %2388 = vst [vmem:[%s3662_s30] sm:$0xff] %v2751_v18  ;;  %v1473_v60 = vadd.f32 1.0, %v2980_v33  ;;  %2993 = verf.f32 %v1284_v7 }
 0x131   : > { %v2984_v47 = vpop.eup %2983  ;;  %v1803_v26 = vmul.f32 %v3579_v10, %v1663_v35  ;;  %v1664_v51 = vmul.f32 %v1536_v38, %v3595_v31  ;;  %v3659_v54 = vpop.f32.mrb[13].mxu1  ;;  %v1879_v27 = vadd.f32 %v3581_v11, %v1739_v42  ;;  %v1537_v61 = vadd.f32 1.0, %v2982_v39  ;;  %2420 = vst [vmem:[%s3662_s30 + $0x100] sm:$0xff] %v2783_v48 }
 0x132   : > { %v2986_v55 = vpop.eup %2985  ;;  %v1740_v59 = vmul.f32 %v3575_v3, %v1600_v43  ;;  %v3667_v62 = vpop.f32.mrb[14].mxu0  ;;  %v1474_v5 = vadd.f32 1.0, %v2984_v47  ;;  %v1601_v14 = vmul.f32 %v1473_v60, %v3597_v36  ;;  %v3706_v42 = vmul.f32 0.5, %v3614_v57 }
 0x133   : > { %v3669_v1 = vpop.f32.mrb[14].mxu1  ;;  %v2988_v31 = vpop.eup %2987  ;;  %v1943_v2 = vadd.f32 %v3581_v11, %v1803_v26  ;;  %v1804_v4 = vmul.f32 %v3575_v3, %v1664_v51  ;;  %v1538_v12 = vadd.f32 1.0, %v2986_v55  ;;  %v2752_v19 = vpack.c.bf16 %v1879_v27, %v1878_v40 }
 0x134   : > { %v3674_v13 = vpop.f32.mrb[15].mxu0  ;;  %v3676_v15 = vpop.f32.mrb[15].mxu1  ;;  %v1880_v20 = vadd.f32 %v3577_v6, %v1740_v59  ;;  %v1665_v21 = vmul.f32 %v1537_v61, %v3599_v37  ;;  %v1602_v25 = vmul.f32 %v1474_v5, %v3601_v41  ;;  %v1741_v29 = vmul.f32 %v3579_v10, %v1601_v14 }
 0x135   : > { %v2990_v16 = vpop.eup %2989  ;;  %v2784_v23 = vpack.c.bf16 %v1943_v2, %v1942_v49  ;;  %v1944_v24 = vadd.f32 %v3577_v6, %v1804_v4  ;;  %v1666_v28 = vmul.f32 %v1538_v12, %v3603_v45  ;;  %2389 = vst [vmem:[%s3662_s30 + $0x8] sm:$0xff] %v2752_v19  ;;  %v1475_v32 = vadd.f32 1.0, %v2988_v31 }
 0x136   : > { %v1805_v30 = vmul.f32 %v3579_v10, %v1665_v21  ;;  %v1539_v33 = vadd.f32 1.0, %v2990_v16  ;;  %v1742_v17 = vmul.f32 %v3575_v3, %v1602_v25  ;;  %v3692_v37 = vmul.f32 0.5, %v3609_v52  ;;  %v3698_v38 = vpop.f32.mrb[16].mxu0  ;;  %v3700_v39 = vpop.f32.mrb[16].mxu1 }
 0x137   : > { %2421 = vst [vmem:[%s3662_s30 + $0x108] sm:$0xff] %v2784_v23  ;;  %v1806_v36 = vmul.f32 %v3575_v3, %v1666_v28  ;;  %v1881_v41 = vadd.f32 %v3581_v11, %v1741_v29  ;;  %v1603_v34 = vmul.f32 %v1475_v32, %v3605_v46  ;;  %v3708_v43 = vpop.f32.mrb[17].mxu0  ;;  %v3710_v46 = vpop.f32.mrb[17].mxu1  ;;  %v1221_v52 = vmul.f32 0.70710677, %v3614_v57 }
 0x138   : > { %v1945_v45 = vadd.f32 %v3581_v11, %v1805_v30  ;;  %v1667_v35 = vmul.f32 %v1539_v33, %v3607_v50  ;;  %v1882_v18 = vadd.f32 %v3577_v6, %v1742_v17  ;;  %v3714_v26 = vpop.f32.mrb[18].mxu0  ;;  %v3716_v51 = vpop.f32.mrb[18].mxu1  ;;  %v3720_v55 = vmul.f32 0.5, %v3616_v58 }
 0x139   : > { %v1946_v40 = vadd.f32 %v3577_v6, %v1806_v36  ;;  %v2753_v50 = vpack.c.bf16 %v1881_v41, %v1880_v20  ;;  %v1743_v48 = vmul.f32 %v3579_v10, %v1603_v34  ;;  %v1285_v27 = vmul.f32 0.70710677, %v3616_v58  ;;  %v3723_v59 = vpop.f32.mrb[19].mxu0  ;;  %v3733_v2 = vpop.f32.mrb[19].mxu1 }
 0x13a   : > { %v2785_v47 = vpack.c.bf16 %v1945_v45, %v1944_v24  ;;  %v1807_v49 = vmul.f32 %v3579_v10, %v1667_v35  ;;  %v3730_v31 = vmul.f32 0.5, %v3619_v63  ;;  %v1222_v57 = vmul.f32 0.70710677, %v3619_v63  ;;  %v2992_v24 = vpop.eup %2991 }
 0x13b   : > { %2390 = vst [vmem:[%s3662_s30 + $0x10] sm:$0xff] %v2753_v50  ;;  %v1883_v60 = vadd.f32 %v3581_v11, %v1743_v48  ;;  %2995 = verf.f32 %v1221_v52  ;;  %v3736_v58 = vmul.f32 0.5, %v3621_v0  ;;  %v1286_v4 = vmul.f32 0.70710677, %v3621_v0 }
 0x13c   : > { %2422 = vst [vmem:[%s3662_s30 + $0x110] sm:$0xff] %v2785_v47  ;;  %v1947_v61 = vadd.f32 %v3581_v11, %v1807_v49  ;;  %v3740_v5 = vmul.f32 0.5, %v3627_v8  ;;  %2997 = verf.f32 %v1285_v27  ;;  %v1223_v19 = vmul.f32 0.70710677, %v3627_v8 }
 0x13d   : > { %v2754_v12 = vpack.c.bf16 %v1883_v60, %v1882_v18  ;;  %2999 = verf.f32 %v1222_v57  ;;  %v3744_v20 = vmul.f32 0.5, %v3629_v9  ;;  %v1287_v63 = vmul.f32 0.70710677, %v3629_v9 }
 0x13e   : > { %v2786_v16 = vpack.c.bf16 %v1947_v61, %v1946_v40  ;;  %v3748_v14 = vmul.f32 0.5, %v3650_v44  ;;  %3001 = verf.f32 %v1286_v4  ;;  %v1224_v0 = vmul.f32 0.70710677, %v3650_v44  ;;  %v3757_v8 = vpop.f32.mrb[20].mxu0  ;;  %v3766_v29 = vpop.f32.mrb[20].mxu1 }
 0x13f   : > { %2391 = vst [vmem:[%s3662_s30 + $0x18] sm:$0xff] %v2754_v12  ;;  %v3754_v21 = vmul.f32 0.5, %v3652_v22  ;;  %v1288_v23 = vmul.f32 0.70710677, %v3652_v22  ;;  %3003 = verf.f32 %v1223_v19  ;;  %v3760_v25 = vmul.f32 0.5, %v3657_v53  ;;  %v3768_v44 = vpop.f32.mrb[21].mxu0 }
 0x140   : > { %2423 = vst [vmem:[%s3662_s30 + $0x118] sm:$0xff] %v2786_v16  ;;  %v1225_v9 = vmul.f32 0.70710677, %v3657_v53  ;;  %v3764_v28 = vmul.f32 0.5, %v3659_v54  ;;  %v1476_v30 = vadd.f32 1.0, %v2992_v24  ;;  %3005 = verf.f32 %v1287_v63  ;;  %v3774_v33 = vpop.f32.mrb[21].mxu1 }
 0x141   : > { %v1289_v22 = vmul.f32 0.70710677, %v3659_v54  ;;  %v3772_v32 = vmul.f32 0.5, %v3667_v62  ;;  %v3776_v17 = vpop.f32.mrb[22].mxu0  ;;  %3007 = verf.f32 %v1224_v0  ;;  %v1226_v53 = vmul.f32 0.70710677, %v3667_v62  ;;  %v2994_v62 = vpop.eup %2993 }
 0x142   : > { %v3780_v36 = vmul.f32 0.5, %v3669_v1  ;;  %v1290_v41 = vmul.f32 0.70710677, %v3669_v1  ;;  %v3783_v45 = vpop.f32.mrb[22].mxu1  ;;  %v1604_v34 = vmul.f32 %v1476_v30, %v3612_v56  ;;  %3009 = verf.f32 %v1288_v23  ;;  %v3790_v18 = vpop.f32.mrb[23].mxu0 }
 0x143   : > { %v3787_v54 = vmul.f32 0.5, %v3674_v13  ;;  %v1227_v35 = vmul.f32 0.70710677, %v3674_v13  ;;  %v3792_v40 = vpop.f32.mrb[23].mxu1  ;;  %3011 = verf.f32 %v1225_v9  ;;  %v3795_v7 = vmul.f32 0.5, %v3676_v15 }
 0x144   : > { %v1291_v1 = vmul.f32 0.70710677, %v3676_v15  ;;  %v3799_v50 = vmul.f32 0.5, %v3698_v38  ;;  %v1744_v56 = vmul.f32 %v3575_v3, %v1604_v34  ;;  %v1540_v47 = vadd.f32 1.0, %v2994_v62 }
 0x145   : > { %3013 = verf.f32 %v1289_v22  ;;  %v1228_v13 = vmul.f32 0.70710677, %v3698_v38  ;;  %v2996_v48 = vpop.eup %2995  ;;  %v3804_v49 = vmul.f32 0.5, %v3700_v39  ;;  %v1292_v52 = vmul.f32 0.70710677, %v3700_v39 }
 0x146   : > { %3015 = verf.f32 %v1226_v53  ;;  %v3808_v27 = vmul.f32 0.5, %v3708_v43  ;;  %v2998_v15 = vpop.eup %2997  ;;  %v1884_v60 = vadd.f32 %v3577_v6, %v1744_v56  ;;  %v1668_v61 = vmul.f32 %v1540_v47, %v3692_v37  ;;  %v3812_v4 = vpop.f32.mrb[24].mxu0 }
 0x147   : > { %v1477_v57 = vadd.f32 1.0, %v2996_v48  ;;  %3017 = verf.f32 %v1290_v41  ;;  %v3814_v38 = vpop.f32.mrb[24].mxu1  ;;  %v3000_v12 = vpop.eup %2999  ;;  %v1541_v16 = vadd.f32 1.0, %v2998_v15  ;;  %v3817_v19 = vmul.f32 0.70710677, %v3708_v43 }
 0x148   : > { %3019 = verf.f32 %v1227_v35  ;;  %v3820_v39 = vmul.f32 0.5, %v3710_v46  ;;  %v3822_v63 = vpop.f32.mrb[25].mxu0  ;;  %v3824_v0 = vpop.f32.mrb[25].mxu1  ;;  %v1808_v23 = vmul.f32 %v3575_v3, %v1668_v61  ;;  %v1478_v9 = vadd.f32 1.0, %v3000_v12 }
 0x149   : > { %v3002_v37 = vpop.eup %3001  ;;  %v1605_v24 = vmul.f32 %v1477_v57, %v3706_v42  ;;  %3021 = verf.f32 %v1291_v1  ;;  %v3828_v30 = vpop.f32.mrb[26].mxu0  ;;  %v1669_v53 = vmul.f32 %v1541_v16, %v3720_v55  ;;  %v3834_v34 = vmul.f32 0.70710677, %v3710_v46 }
 0x14a   : > { %v3830_v22 = vpop.f32.mrb[26].mxu1  ;;  %v3004_v43 = vpop.eup %3003  ;;  %v1542_v41 = vadd.f32 1.0, %v3002_v37  ;;  %3023 = verf.f32 %v1228_v13  ;;  %v1948_v42 = vadd.f32 %v3577_v6, %v1808_v23  ;;  %v1606_v47 = vmul.f32 %v1478_v9, %v3730_v31 }
 0x14b   : > { %v3836_v35 = vpop.f32.mrb[27].mxu0  ;;  %v3838_v62 = vpop.f32.mrb[27].mxu1  ;;  %v1745_v1 = vmul.f32 %v3579_v10, %v1605_v24  ;;  %v1479_v48 = vadd.f32 1.0, %v3004_v43  ;;  %v1809_v55 = vmul.f32 %v3579_v10, %v1669_v53  ;;  %3025 = verf.f32 %v1292_v52 }
 0x14c   : > { %v3006_v56 = vpop.eup %3005  ;;  %v1670_v13 = vmul.f32 %v1542_v41, %v3736_v58  ;;  %v1746_v12 = vmul.f32 %v3575_v3, %v1606_v47  ;;  %3027 = verf.f32 %v3817_v19 }
 0x14d   : > { %v3008_v15 = vpop.eup %3007  ;;  %v1543_v61 = vadd.f32 1.0, %v3006_v56  ;;  %v1885_v57 = vadd.f32 %v3581_v11, %v1745_v1  ;;  %v1607_v16 = vmul.f32 %v1479_v48, %v3740_v5  ;;  %v1949_v24 = vadd.f32 %v3581_v11, %v1809_v55 }
 0x14e   : > { %v3010_v46 = vpop.eup %3009  ;;  %v1480_v37 = vadd.f32 1.0, %v3008_v15  ;;  %v1810_v31 = vmul.f32 %v3575_v3, %v1670_v13  ;;  %v1886_v52 = vadd.f32 %v3577_v6, %v1746_v12  ;;  %v3854_v1 = vpop.f32.mrb[28].mxu0  ;;  %3029 = verf.f32 %v3834_v34 }
 0x14f   : > { %v3012_v23 = vpop.eup %3011  ;;  %v1671_v9 = vmul.f32 %v1543_v61, %v3744_v20  ;;  %v1544_v43 = vadd.f32 1.0, %v3010_v46  ;;  %v2755_v53 = vpack.c.bf16 %v1885_v57, %v1884_v60  ;;  %v1747_v41 = vmul.f32 %v3579_v10, %v1607_v16  ;;  %v3856_v5 = vpop.f32.mrb[28].mxu1 }
 0x150   : > { %v3014_v58 = vpop.eup %3013  ;;  %v1608_v56 = vmul.f32 %v1480_v37, %v3748_v14  ;;  %v2787_v48 = vpack.c.bf16 %v1949_v24, %v1948_v42  ;;  %v1950_v15 = vadd.f32 %v3577_v6, %v1810_v31  ;;  %v3861_v60 = vpop.f32.mrb[29].mxu0  ;;  %v1481_v57 = vadd.f32 1.0, %v3012_v23 }
 0x151   : > { %v3016_v47 = vpop.eup %3015  ;;  %v1811_v20 = vmul.f32 %v3579_v10, %v1671_v9  ;;  %v1672_v55 = vmul.f32 %v1544_v43, %v3754_v21  ;;  %v3863_v13 = vpop.f32.mrb[29].mxu1  ;;  %2392 = vst [vmem:[%s3662_s30 + $0x20] sm:$0xff] %v2755_v53  ;;  %v1887_v14 = vadd.f32 %v3581_v11, %v1747_v41  ;;  %v1545_v12 = vadd.f32 1.0, %v3014_v58 }
 0x152   : > { %v3018_v61 = vpop.eup %3017  ;;  %v1748_v46 = vmul.f32 %v3575_v3, %v1608_v56  ;;  %v3868_v16 = vpop.f32.mrb[30].mxu0  ;;  %2424 = vst [vmem:[%s3662_s30 + $0x120] sm:$0xff] %v2787_v48  ;;  %v1482_v31 = vadd.f32 1.0, %v3016_v47  ;;  %v1609_v56 = vmul.f32 %v1481_v57, %v3760_v25 }
 0x153   : > { %4842 = vst [vmem:[#allocation6_spill] sm:$0xff] %v3868_v16  ;;  %v3870_v42 = vpop.f32.mrb[30].mxu1  ;;  %v3020_v37 = vpop.eup %3019  ;;  %v1951_v21 = vadd.f32 %v3581_v11, %v1811_v20  ;;  %v1812_v24 = vmul.f32 %v3575_v3, %v1672_v55  ;;  %v1546_v9 = vadd.f32 1.0, %v3018_v61  ;;  %v2756_v23 = vpack.c.bf16 %v1887_v14, %v1886_v52 }
 0x154   : > { %4843 = vst [vmem:[#allocation7_spill] sm:$0xff] %v3870_v42  ;;  %v3875_v43 = vpop.f32.mrb[31].mxu0  ;;  %v3877_v53 = vpop.f32.mrb[31].mxu1  ;;  %v1888_v58 = vadd.f32 %v3577_v6, %v1748_v46  ;;  %v1673_v48 = vmul.f32 %v1545_v12, %v3764_v28  ;;  %v1610_v47 = vmul.f32 %v1482_v31, %v3772_v32  ;;  %v1749_v61 = vmul.f32 %v3579_v10, %v1609_v56 }
 0x155   : > { %4844 = vst [vmem:[#allocation8_spill] sm:$0xff] %v3877_v53  ;;  %v3022_v41 = vpop.eup %3021  ;;  %v2788_v20 = vpack.c.bf16 %v1951_v21, %v1950_v15  ;;  %v1952_v16 = vadd.f32 %v3577_v6, %v1812_v24  ;;  %v1674_v55 = vmul.f32 %v1546_v9, %v3780_v36  ;;  %2393 = vst [vmem:[%s3662_s30 + $0x28] sm:$0xff] %v2756_v23  ;;  %v1483_v52 = vadd.f32 1.0, %v3020_v37 }
 0x156   : > { %v3024_v42 = vpop.eup %3023  ;;  %v1813_v53 = vmul.f32 %v3579_v10, %v1673_v48  ;;  %v1547_v14 = vadd.f32 1.0, %v3022_v41  ;;  %v1750_v25 = vmul.f32 %v3575_v3, %v1610_v47  ;;  %v1889_v32 = vadd.f32 %v3581_v11, %v1749_v61  ;;  %v3896_v21 = vpop.f32.mrb[32].mxu0 }
 0x157   : > { %v3026_v46 = vpop.eup %3025  ;;  %2425 = vst [vmem:[%s3662_s30 + $0x128] sm:$0xff] %v2788_v20  ;;  %v1814_v28 = vmul.f32 %v3575_v3, %v1674_v55  ;;  %v1484_v15 = vadd.f32 1.0, %v3024_v42  ;;  %v1611_v57 = vmul.f32 %v1483_v52, %v3787_v54  ;;  %v3898_v37 = vpop.f32.mrb[32].mxu1  ;;  %v3917_v47 = vmul.f32 0.5, %v3714_v26 }
 0x158   : > { %v1953_v36 = vadd.f32 %v3581_v11, %v1813_v53  ;;  %v1675_v12 = vmul.f32 %v1547_v14, %v3795_v7  ;;  %v1890_v24 = vadd.f32 %v3577_v6, %v1750_v25  ;;  %v1548_v19 = vadd.f32 1.0, %v3026_v46  ;;  %v3903_v9 = vpop.f32.mrb[33].mxu0  ;;  %v3905_v53 = vpop.f32.mrb[33].mxu1 }
 0x159   : > { %v1954_v31 = vadd.f32 %v3577_v6, %v1814_v28  ;;  %v1612_v42 = vmul.f32 %v1484_v15, %v3799_v50  ;;  %v2757_v54 = vpack.c.bf16 %v1889_v32, %v1888_v58  ;;  %v1751_v7 = vmul.f32 %v3579_v10, %v1611_v57  ;;  %v3909_v56 = vpop.f32.mrb[34].mxu0  ;;  %v3911_v48 = vpop.f32.mrb[34].mxu1 }
 0x15a   : > { %v2789_v41 = vpack.c.bf16 %v1953_v36, %v1952_v16  ;;  %v1815_v23 = vmul.f32 %v3579_v10, %v1675_v12  ;;  %v1676_v50 = vmul.f32 %v1548_v19, %v3804_v49  ;;  %v3919_v55 = vpop.f32.mrb[35].mxu0  ;;  %v3921_v16 = vpop.f32.mrb[35].mxu1  ;;  %v1230_v52 = vmul.f32 0.70710677, %v3714_v26 }
 0x15b   : > { %v1752_v20 = vmul.f32 %v3575_v3, %v1612_v42  ;;  %2394 = vst [vmem:[%s3662_s30 + $0x30] sm:$0xff] %v2757_v54  ;;  %v1891_v58 = vadd.f32 %v3581_v11, %v1751_v7  ;;  %v3929_v49 = vmul.f32 0.5, %v3716_v51  ;;  %v1294_v46 = vmul.f32 0.70710677, %v3716_v51  ;;  %v3028_v42 = vpop.eup %3027 }
 0x15c   : > { %2426 = vst [vmem:[%s3662_s30 + $0x130] sm:$0xff] %v2789_v41  ;;  %v1955_v61 = vadd.f32 %v3581_v11, %v1815_v23  ;;  %v1816_v14 = vmul.f32 %v3575_v3, %v1676_v50  ;;  %v3937_v25 = vmul.f32 0.5, %v3723_v59  ;;  %3031 = verf.f32 %v1230_v52 }
 0x15d   : > { %v3932_v34 = vadd.f32 %v3577_v6, %v1752_v20  ;;  %v2758_v28 = vpack.c.bf16 %v1891_v58, %v1890_v24  ;;  %v1231_v32 = vmul.f32 0.70710677, %v3723_v59  ;;  %3033 = verf.f32 %v1294_v46 }
 0x15e   : > { %v2790_v15 = vpack.c.bf16 %v1955_v61, %v1954_v31  ;;  %v3941_v26 = vadd.f32 %v3577_v6, %v1816_v14  ;;  %v3944_v36 = vmul.f32 0.5, %v3733_v2  ;;  %v1295_v57 = vmul.f32 0.70710677, %v3733_v2  ;;  %v3956_v59 = vpop.f32.mrb[36].mxu0  ;;  %v3958_v31 = vpop.f32.mrb[36].mxu1 }
 0x15f   : > { %2395 = vst [vmem:[%s3662_s30 + $0x38] sm:$0xff] %v2758_v28  ;;  %3035 = verf.f32 %v1231_v32  ;;  %v3950_v51 = vmul.f32 0.5, %v3757_v8  ;;  %v1232_v12 = vmul.f32 0.70710677, %v3757_v8  ;;  %v3954_v24 = vmul.f32 0.5, %v3766_v29  ;;  %v3965_v41 = vpop.f32.mrb[37].mxu0 }
 0x160   : > { %2427 = vst [vmem:[%s3662_s30 + $0x138] sm:$0xff] %v2790_v15  ;;  %3037 = verf.f32 %v1295_v57  ;;  %v1296_v19 = vmul.f32 0.70710677, %v3766_v29  ;;  %v3962_v2 = vmul.f32 0.5, %v3768_v44  ;;  %v1233_v54 = vmul.f32 0.70710677, %v3768_v44  ;;  %v3030_v15 = vpop.eup %3029 }
 0x161   : > { %v1485_v7 = vadd.f32 1.0, %v3028_v42  ;;  %3039 = verf.f32 %v1232_v12  ;;  %v3968_v8 = vmul.f32 0.5, %v3774_v33  ;;  %v1297_v23 = vmul.f32 0.70710677, %v3774_v33  ;;  %v3971_v20 = vpop.f32.mrb[37].mxu1  ;;  %v3973_v50 = vpop.f32.mrb[38].mxu0 }
 0x162   : > { %3041 = verf.f32 %v1296_v19  ;;  %v3976_v29 = vmul.f32 0.5, %v3776_v17  ;;  %v1234_v58 = vmul.f32 0.70710677, %v3776_v17  ;;  %v3980_v44 = vmul.f32 0.5, %v3783_v45  ;;  %v3982_v61 = vpop.f32.mrb[38].mxu1  ;;  %v3984_v52 = vpop.f32.mrb[39].mxu0 }
 0x163   : > { %4845 = vst [vmem:[#allocation9_spill] sm:$0xff] %v3982_v61  ;;  %4846 = vst [vmem:[#allocation10_spill] sm:$0xff] %v3984_v52  ;;  %v1613_v14 = vmul.f32 %v1485_v7, %v3808_v27  ;;  %3043 = verf.f32 %v1233_v54  ;;  %v1298_v33 = vmul.f32 0.70710677, %v3783_v45  ;;  %v3989_v46 = vmul.f32 0.5, %v3790_v18  ;;  %v3991_v28 = vpop.f32.mrb[39].mxu1 }
 0x164   : > { %4847 = vst [vmem:[#allocation11_spill] sm:$0xff] %v3991_v28  ;;  %3045 = verf.f32 %v1297_v23  ;;  %v1235_v17 = vmul.f32 0.70710677, %v3790_v18  ;;  %v3995_v32 = vmul.f32 0.5, %v3792_v40  ;;  %v1299_v57 = vmul.f32 0.70710677, %v3792_v40 }
 0x165   : > { %v1753_v12 = vmul.f32 %v3579_v10, %v1613_v14  ;;  %v1549_v27 = vadd.f32 1.0, %v3030_v15  ;;  %3047 = verf.f32 %v1234_v58  ;;  %v4000_v45 = vmul.f32 0.5, %v3812_v4 }
 0x166   : > { %3049 = verf.f32 %v1298_v33  ;;  %v1236_v42 = vmul.f32 0.70710677, %v3812_v4  ;;  %v4004_v19 = vmul.f32 0.5, %v3814_v38  ;;  %v1300_v18 = vmul.f32 0.70710677, %v3814_v38  ;;  %v3032_v54 = vpop.eup %3031  ;;  %v4012_v58 = vpop.f32.mrb[40].mxu0 }
 0x167   : > { %v1893_v7 = vadd.f32 %v3581_v11, %v1753_v12  ;;  %v1677_v40 = vmul.f32 %v1549_v27, %v3820_v39  ;;  %3051 = verf.f32 %v1235_v17  ;;  %v4010_v23 = vmul.f32 0.5, %v3822_v63  ;;  %4848 = vst [vmem:[#allocation12_spill] sm:$0xff] %v4012_v58  ;;  %v4014_v14 = vpop.f32.mrb[40].mxu1  ;;  %v3034_v33 = vpop.eup %3033 }
 0x168   : > { %4849 = vst [vmem:[#allocation13_spill] sm:$0xff] %v4014_v14  ;;  %v1486_v4 = vadd.f32 1.0, %v3032_v54  ;;  %3053 = verf.f32 %v1299_v57  ;;  %v1237_v15 = vmul.f32 0.70710677, %v3822_v63  ;;  %v4018_v38 = vmul.f32 0.5, %v3824_v0  ;;  %v4020_v28 = vpop.f32.mrb[41].mxu0 }
 0x169   : > { %4850 = vst [vmem:[#allocation14_spill] sm:$0xff] %v4020_v28  ;;  %v4022_v12 = vpop.f32.mrb[41].mxu1  ;;  %v3036_v39 = vpop.eup %3035  ;;  %v2759_v17 = vpack.c.bf16 %v1893_v7, %v3932_v34  ;;  %v1817_v27 = vmul.f32 %v3579_v10, %v1677_v40  ;;  %v1550_v58 = vadd.f32 1.0, %v3034_v33  ;;  %3055 = verf.f32 %v1236_v42 }
 0x16a   : > { %4851 = vst [vmem:[#allocation15_spill] sm:$0xff] %v4022_v12  ;;  %v4026_v14 = vpop.f32.mrb[42].mxu0  ;;  %v4028_v57 = vpop.f32.mrb[42].mxu1  ;;  %v1614_v54 = vmul.f32 %v1486_v4, %v3917_v47  ;;  %v1487_v52 = vadd.f32 1.0, %v3036_v39  ;;  %3057 = verf.f32 %v1300_v18  ;;  %v1301_v28 = vmul.f32 0.70710677, %v3824_v0 }
 0x16b   : > { %v3038_v63 = vpop.eup %3037  ;;  %v4032_v12 = vpop.f32.mrb[43].mxu0  ;;  %2396 = vst [vmem:[%s3662_s30 + $0x40] sm:$0xff] %v2759_v17  ;;  %v1957_v7 = vadd.f32 %v3581_v11, %v1817_v27  ;;  %v1678_v42 = vmul.f32 %v1550_v58, %v3929_v49  ;;  %3059 = verf.f32 %v1237_v15 }
 0x16c   : > { %4852 = vst [vmem:[#allocation16_spill] sm:$0xff] %v4032_v12  ;;  %v4034_v61 = vpop.f32.mrb[43].mxu1  ;;  %v3040_v34 = vpop.eup %3039  ;;  %v1551_v40 = vadd.f32 1.0, %v3038_v63  ;;  %v1754_v47 = vmul.f32 %v3575_v3, %v1614_v54  ;;  %v1615_v18 = vmul.f32 %v1487_v52, %v3937_v25  ;;  %3061 = verf.f32 %v1301_v28 }
 0x16d   : > { %4853 = vst [vmem:[#allocation17_spill] sm:$0xff] %v4034_v61  ;;  %v3042_v33 = vpop.eup %3041  ;;  %v1488_v4 = vadd.f32 1.0, %v3040_v34  ;;  %v2791_v39 = vpack.c.bf16 %v1957_v7, %v3941_v26  ;;  %v1818_v61 = vmul.f32 %v3575_v3, %v1678_v42 }
 0x16e   : > { %v3044_v0 = vpop.eup %3043  ;;  %v1679_v17 = vmul.f32 %v1551_v40, %v3944_v36  ;;  %v1552_v27 = vadd.f32 1.0, %v3042_v33  ;;  %v1894_v49 = vadd.f32 %v3577_v6, %v1754_v47  ;;  %v1755_v58 = vmul.f32 %v3579_v10, %v1615_v18  ;;  %v4051_v34 = vpop.f32.mrb[44].mxu0 }
 0x16f   : > { %v3046_v12 = vpop.eup %3045  ;;  %v1616_v15 = vmul.f32 %v1488_v4, %v3950_v51  ;;  %v1489_v63 = vadd.f32 1.0, %v3044_v0  ;;  %2428 = vst [vmem:[%s3662_s30 + $0x140] sm:$0xff] %v2791_v39  ;;  %v1958_v25 = vadd.f32 %v3577_v6, %v1818_v61  ;;  %v4053_v36 = vpop.f32.mrb[44].mxu1 }
 0x170   : > { %v3048_v54 = vpop.eup %3047  ;;  %v1819_v52 = vmul.f32 %v3579_v10, %v1679_v17  ;;  %v1680_v26 = vmul.f32 %v1552_v27, %v3954_v24  ;;  %v1553_v28 = vadd.f32 1.0, %v3046_v12  ;;  %v1895_v42 = vadd.f32 %v3581_v11, %v1755_v58  ;;  %v4058_v47 = vpop.f32.mrb[45].mxu0 }
 0x171   : > { %v3050_v7 = vpop.eup %3049  ;;  %v1756_v40 = vmul.f32 %v3575_v3, %v1616_v15  ;;  %v1617_v51 = vmul.f32 %v1489_v63, %v3962_v2  ;;  %v1490_v33 = vadd.f32 1.0, %v3048_v54  ;;  %v4060_v61 = vpop.f32.mrb[45].mxu1 }
 0x172   : > { %v3052_v18 = vpop.eup %3051  ;;  %v1959_v24 = vadd.f32 %v3581_v11, %v1819_v52  ;;  %v1820_v12 = vmul.f32 %v3575_v3, %v1680_v26  ;;  %v1681_v4 = vmul.f32 %v1553_v28, %v3968_v8  ;;  %v1554_v0 = vadd.f32 1.0, %v3050_v7  ;;  %v4065_v39 = vpop.f32.mrb[46].mxu0 }
 0x173   : > { %v4067_v17 = vpop.f32.mrb[46].mxu1  ;;  %v3054_v27 = vpop.eup %3053  ;;  %v2760_v2 = vpack.c.bf16 %v1895_v42, %v1894_v49  ;;  %v1896_v58 = vadd.f32 %v3577_v6, %v1756_v40  ;;  %v1757_v15 = vmul.f32 %v3579_v10, %v1617_v51  ;;  %v1618_v63 = vmul.f32 %v1490_v33, %v3976_v29 }
 0x174   : > { %4854 = vst [vmem:[#allocation18_spill] sm:$0xff] %v4067_v17  ;;  %v4072_v54 = vpop.f32.mrb[47].mxu0  ;;  %v4074_v52 = vpop.f32.mrb[47].mxu1  ;;  %v2792_v26 = vpack.c.bf16 %v1959_v24, %v1958_v25  ;;  %v1960_v28 = vadd.f32 %v3577_v6, %v1820_v12  ;;  %v1821_v7 = vmul.f32 %v3579_v10, %v1681_v4  ;;  %v1682_v17 = vmul.f32 %v1554_v0, %v3980_v44 }
 0x175   : > { %4855 = vst [vmem:[#allocation19_spill] sm:$0xff] %v4072_v54  ;;  %4856 = vst [vmem:[#allocation20_spill] sm:$0xff] %v4074_v52  ;;  %v3056_v8 = vpop.eup %3055  ;;  %v1897_v42 = vadd.f32 %v3581_v11, %v1757_v15  ;;  %v1758_v40 = vmul.f32 %v3575_v3, %v1618_v63  ;;  %v1491_v51 = vadd.f32 1.0, %v3052_v18  ;;  %v1555_v29 = vadd.f32 1.0, %v3054_v27 }
 0x176   : > { %v3058_v49 = vpop.eup %3057  ;;  %2397 = vst [vmem:[%s3662_s30 + $0x48] sm:$0xff] %v2760_v2  ;;  %2429 = vst [vmem:[%s3662_s30 + $0x148] sm:$0xff] %v2792_v26  ;;  %v1961_v52 = vadd.f32 %v3581_v11, %v1821_v7  ;;  %v1822_v25 = vmul.f32 %v3575_v3, %v1682_v17  ;;  %v1492_v24 = vadd.f32 1.0, %v3056_v8  ;;  %v4091_v26 = vpop.f32.mrb[48].mxu0 }
 0x177   : > { %v3060_v33 = vpop.eup %3059  ;;  %v1556_v12 = vadd.f32 1.0, %v3058_v49  ;;  %v2761_v54 = vpack.c.bf16 %v1897_v42, %v1896_v58  ;;  %v1898_v44 = vadd.f32 %v3577_v6, %v1758_v40  ;;  %v1619_v0 = vmul.f32 %v1491_v51, %v3989_v46  ;;  %v4093_v17 = vpop.f32.mrb[48].mxu1 }
 0x178   : > { %v3062_v4 = vpop.eup %3061  ;;  %v1683_v2 = vmul.f32 %v1555_v29, %v3995_v32  ;;  %v2793_v18 = vpack.c.bf16 %v1961_v52, %v1960_v28  ;;  %v1962_v27 = vadd.f32 %v3577_v6, %v1822_v25  ;;  %v1620_v15 = vmul.f32 %v1492_v24, %v4000_v45  ;;  %v4098_v49 = vpop.f32.mrb[49].mxu0 }
 0x179   : > { %v1684_v63 = vmul.f32 %v1556_v12, %v4004_v19  ;;  %2398 = vst [vmem:[%s3662_s30 + $0x50] sm:$0xff] %v2761_v54  ;;  %v1759_v58 = vmul.f32 %v3579_v10, %v1619_v0  ;;  %v1493_v7 = vadd.f32 1.0, %v3060_v33  ;;  %v1557_v46 = vadd.f32 1.0, %v3062_v4  ;;  %v4100_v32 = vpop.f32.mrb[49].mxu1  ;;  %v4106_v28 = vpop.f32.mrb[50].mxu0 }
 0x17a   : > { %v1823_v8 = vmul.f32 %v3579_v10, %v1683_v2  ;;  %2430 = vst [vmem:[%s3662_s30 + $0x150] sm:$0xff] %v2793_v18  ;;  %v1760_v45 = vmul.f32 %v3575_v3, %v1620_v15  ;;  %v1238_v52 = vmul.f32 0.70710677, %v3828_v30  ;;  %v4108_v54 = vpop.f32.mrb[50].mxu1  ;;  %v4114_v33 = vpop.f32.mrb[51].mxu0  ;;  %v4124_v15 = vmul.f32 0.5, %v3830_v22 }
 0x17b   : > { %v1824_v19 = vmul.f32 %v3575_v3, %v1684_v63  ;;  %v1899_v42 = vadd.f32 %v3581_v11, %v1759_v58  ;;  %v1621_v51 = vmul.f32 %v1493_v7, %v4010_v23  ;;  %v1685_v29 = vmul.f32 %v1557_v46, %v4018_v38  ;;  %v4116_v25 = vpop.f32.mrb[51].mxu1 }
 0x17c   : > { %v1963_v40 = vadd.f32 %v3581_v11, %v1823_v8  ;;  %4857 = vst [vmem:[#allocation21_spill] sm:$0xff] %v4116_v25  ;;  %v1900_v24 = vadd.f32 %v3577_v6, %v1760_v45  ;;  %3063 = verf.f32 %v1238_v52  ;;  %v1110_v23 = vmul.f32 0.5, %v3828_v30 }
 0x17d   : > { %v1964_v12 = vadd.f32 %v3577_v6, %v1824_v19  ;;  %v2762_v4 = vpack.c.bf16 %v1899_v42, %v1898_v44  ;;  %v1761_v2 = vmul.f32 %v3579_v10, %v1621_v51  ;;  %v1825_v18 = vmul.f32 %v3579_v10, %v1685_v29 }
 0x17e   : > { %v2794_v0 = vpack.c.bf16 %v1963_v40, %v1962_v27  ;;  %v1302_v38 = vmul.f32 0.70710677, %v3830_v22  ;;  %v1239_v63 = vmul.f32 0.70710677, %v3836_v35  ;;  %v4133_v27 = vmul.f32 0.5, %v3836_v35  ;;  %v4141_v46 = vpop.f32.mrb[52].mxu0 }
 0x17f   : > { %2399 = vst [vmem:[%s3662_s30 + $0x58] sm:$0xff] %v2762_v4  ;;  %v1901_v58 = vadd.f32 %v3581_v11, %v1761_v2  ;;  %v1965_v44 = vadd.f32 %v3581_v11, %v1825_v18  ;;  %v1303_v8 = vmul.f32 0.70710677, %v3838_v62  ;;  %v4137_v30 = vmul.f32 0.5, %v3838_v62  ;;  %4858 = vst [vmem:[#allocation22_spill] sm:$0xff] %v4141_v46  ;;  %v4146_v52 = vpop.f32.mrb[52].mxu1 }
 0x180   : > { %2431 = vst [vmem:[%s3662_s30 + $0x158] sm:$0xff] %v2794_v0  ;;  %3065 = verf.f32 %v1302_v38  ;;  %v1240_v22 = vmul.f32 0.70710677, %v3854_v1  ;;  %v1304_v7 = vmul.f32 0.70710677, %v3856_v5  ;;  %v4144_v35 = vmul.f32 0.5, %v3854_v1 }
 0x181   : > { %v2763_v45 = vpack.c.bf16 %v1901_v58, %v1900_v24  ;;  %v2795_v19 = vpack.c.bf16 %v1965_v44, %v1964_v12  ;;  %3067 = verf.f32 %v1239_v63  ;;  %4859 = vst [vmem:[#allocation23_spill] sm:$0xff] %v4146_v52  ;;  %v4148_v42 = vpop.f32.mrb[53].mxu0  ;;  %v4151_v62 = vmul.f32 0.5, %v3856_v5  ;;  %v4155_v29 = vpop.f32.mrb[53].mxu1  ;;  %v4862_v12 = vld [vmem:[#allocation6_spill] sm:$0xff]  ;;  %v4865_v18 = vld [vmem:[#allocation7_spill] sm:$0xff] }
 0x182   : > { %4860 = vst [vmem:[#allocation24_spill] sm:$0xff] %v4148_v42  ;;  %3069 = verf.f32 %v1303_v8  ;;  %v1241_v40 = vmul.f32 0.70710677, %v3861_v60  ;;  %v1305_v51 = vmul.f32 0.70710677, %v3863_v13  ;;  %4861 = vst [vmem:[#allocation25_spill] sm:$0xff] %v4155_v29 }
 0x183   : > { %2400 = vst [vmem:[%s3662_s30 + $0x60] sm:$0xff] %v2763_v45  ;;  %2432 = vst [vmem:[%s3662_s30 + $0x160] sm:$0xff] %v2795_v19  ;;  %3071 = verf.f32 %v1240_v22  ;;  %v4160_v1 = vmul.f32 0.5, %v3861_v60  ;;  %v4163_v24 = vmul.f32 0.5, %v3863_v13  ;;  %v1242_v4 = vmul.f32 0.70710677, %v4862_v12 }
 0x184   : > { %v4166_v0 = vpop.f32.mrb[54].mxu0  ;;  %v4168_v5 = vpop.f32.mrb[54].mxu1  ;;  %3073 = verf.f32 %v1304_v7  ;;  %v4171_v2 = vmul.f32 0.5, %v4862_v12  ;;  %v4174_v38 = vmul.f32 0.5, %v4865_v18  ;;  %v1306_v63 = vmul.f32 0.70710677, %v4865_v18 }
 0x185   : > { %4863 = vst [vmem:[#allocation6_spill] sm:$0xff] %v4166_v0  ;;  %4864 = vst [vmem:[#allocation26_spill] sm:$0xff] %v4168_v5  ;;  %v4177_v60 = vpop.f32.mrb[55].mxu0  ;;  %3075 = verf.f32 %v1241_v40  ;;  %v4180_v13 = vmul.f32 0.5, %v3875_v43  ;;  %v1243_v58 = vmul.f32 0.70710677, %v3875_v43 }
 0x186   : > { %4866 = vst [vmem:[#allocation7_spill] sm:$0xff] %v4177_v60  ;;  %v4867_v44 = vld [vmem:[#allocation8_spill] sm:$0xff]  ;;  %v4186_v22 = vpop.f32.mrb[55].mxu1  ;;  %v3064_v7 = vpop.eup %3063  ;;  %3077 = verf.f32 %v1305_v51  ;;  %v4190_v19 = vmul.f32 0.5, %v3896_v21  ;;  %v1244_v12 = vmul.f32 0.70710677, %v3896_v21 }
 0x187   : > { %v4184_v8 = vmul.f32 0.5, %v4867_v44  ;;  %4868 = vst [vmem:[#allocation8_spill] sm:$0xff] %v4186_v22  ;;  %v1307_v45 = vmul.f32 0.70710677, %v4867_v44  ;;  %v1494_v40 = vadd.f32 1.0, %v3064_v7  ;;  %3079 = verf.f32 %v1242_v4  ;;  %v4204_v22 = vpop.f32.mrb[56].mxu0 }
 0x188   : > { %v4194_v18 = vmul.f32 0.5, %v3898_v37  ;;  %v1308_v43 = vmul.f32 0.70710677, %v3898_v37  ;;  %3081 = verf.f32 %v1306_v63  ;;  %v4198_v60 = vmul.f32 0.5, %v3903_v9  ;;  %4869 = vst [vmem:[#allocation27_spill] sm:$0xff] %v4204_v22  ;;  %v4206_v5 = vpop.f32.mrb[56].mxu1 }
 0x189   : > { %v1245_v51 = vmul.f32 0.70710677, %v3903_v9  ;;  %v4202_v44 = vmul.f32 0.5, %v3905_v53  ;;  %4870 = vst [vmem:[#allocation28_spill] sm:$0xff] %v4206_v5  ;;  %v1622_v21 = vmul.f32 %v1494_v40, %v1110_v23  ;;  %3083 = verf.f32 %v1243_v58  ;;  %v4212_v37 = vpop.f32.mrb[57].mxu0  ;;  %v4214_v63 = vpop.f32.mrb[57].mxu1 }
 0x18a   : > { %v1309_v4 = vmul.f32 0.70710677, %v3905_v53  ;;  %v4210_v7 = vmul.f32 0.5, %v3909_v56  ;;  %4871 = vst [vmem:[#allocation29_spill] sm:$0xff] %v4212_v37  ;;  %4872 = vst [vmem:[#allocation30_spill] sm:$0xff] %v4214_v63  ;;  %v3066_v0 = vpop.eup %3065  ;;  %3085 = verf.f32 %v1307_v45  ;;  %v4218_v29 = vmul.f32 0.5, %v3911_v48 }
 0x18b   : > { %v1246_v9 = vmul.f32 0.70710677, %v3909_v56  ;;  %v1310_v5 = vmul.f32 0.70710677, %v3911_v48  ;;  %v4221_v23 = vpop.f32.mrb[58].mxu0  ;;  %v3068_v58 = vpop.eup %3067  ;;  %v1762_v53 = vmul.f32 %v3575_v3, %v1622_v21  ;;  %v1558_v40 = vadd.f32 1.0, %v3066_v0 }
 0x18c   : > { %4873 = vst [vmem:[#allocation31_spill] sm:$0xff] %v4221_v23  ;;  %3087 = verf.f32 %v1244_v12  ;;  %v4225_v37 = vmul.f32 0.5, %v3919_v55  ;;  %v4227_v63 = vpop.f32.mrb[58].mxu1  ;;  %v4229_v45 = vpop.f32.mrb[59].mxu0  ;;  %v1495_v22 = vadd.f32 1.0, %v3068_v58 }
 0x18d   : > { %4874 = vst [vmem:[#allocation32_spill] sm:$0xff] %v4227_v63  ;;  %4875 = vst [vmem:[#allocation33_spill] sm:$0xff] %v4229_v45  ;;  %v3070_v56 = vpop.eup %3069  ;;  %3089 = verf.f32 %v1308_v43  ;;  %v4232_v42 = vmul.f32 0.70710677, %v3919_v55  ;;  %v4235_v48 = vmul.f32 0.70710677, %v3921_v16  ;;  %v1902_v12 = vadd.f32 %v3577_v6, %v1762_v53 }
 0x18e   : > { %v4237_v23 = vpop.f32.mrb[59].mxu1  ;;  %v3072_v0 = vpop.eup %3071  ;;  %v1686_v21 = vmul.f32 %v1558_v40, %v4124_v15  ;;  %v1559_v52 = vadd.f32 1.0, %v3070_v56  ;;  %3091 = verf.f32 %v1245_v51  ;;  %v1623_v45 = vmul.f32 %v1495_v22, %v4133_v27 }
 0x18f   : > { %4876 = vst [vmem:[#allocation34_spill] sm:$0xff] %v4237_v23  ;;  %v3074_v63 = vpop.eup %3073  ;;  %v1496_v58 = vadd.f32 1.0, %v3072_v0  ;;  %3093 = verf.f32 %v1309_v4  ;;  %v4243_v55 = vmul.f32 0.70710677, %v3956_v59  ;;  %v4249_v27 = vpop.f32.mrb[60].mxu0 }
 0x190   : > { %v3076_v43 = vpop.eup %3075  ;;  %v1826_v46 = vmul.f32 %v3575_v3, %v1686_v21  ;;  %v1687_v23 = vmul.f32 %v1559_v52, %v4137_v30  ;;  %v1560_v25 = vadd.f32 1.0, %v3074_v63  ;;  %3095 = verf.f32 %v1246_v9  ;;  %v4251_v22 = vpop.f32.mrb[60].mxu1 }
 0x191   : > { %v3078_v53 = vpop.eup %3077  ;;  %v1763_v15 = vmul.f32 %v3579_v10, %v1623_v45  ;;  %v1624_v51 = vmul.f32 %v1496_v58, %v4144_v35  ;;  %v1497_v40 = vadd.f32 1.0, %v3076_v43  ;;  %3097 = verf.f32 %v1310_v5  ;;  %v4256_v63 = vpop.f32.mrb[61].mxu0 }
 0x192   : > { %v3080_v4 = vpop.eup %3079  ;;  %v1966_v56 = vadd.f32 %v3577_v6, %v1826_v46  ;;  %v1827_v0 = vmul.f32 %v3579_v10, %v1687_v23  ;;  %v1688_v30 = vmul.f32 %v1560_v25, %v4151_v62  ;;  %v1561_v52 = vadd.f32 1.0, %v3078_v53  ;;  %4877 = vst [vmem:[#allocation35_spill] sm:$0xff] %v4256_v63  ;;  %v4258_v9 = vpop.f32.mrb[61].mxu1 }
 0x193   : > { %4878 = vst [vmem:[#allocation36_spill] sm:$0xff] %v4258_v9  ;;  %v3082_v45 = vpop.eup %3081  ;;  %v1903_v35 = vadd.f32 %v3581_v11, %v1763_v15  ;;  %v1764_v5 = vmul.f32 %v3575_v3, %v1624_v51  ;;  %v1625_v21 = vmul.f32 %v1497_v40, %v4160_v1  ;;  %v1498_v58 = vadd.f32 1.0, %v3080_v4  ;;  %v4263_v43 = vpop.f32.mrb[62].mxu0 }
 0x194   : > { %4879 = vst [vmem:[#allocation37_spill] sm:$0xff] %v4263_v43  ;;  %v4265_v46 = vpop.f32.mrb[62].mxu1  ;;  %v3084_v23 = vpop.eup %3083  ;;  %v1967_v25 = vadd.f32 %v3581_v11, %v1827_v0  ;;  %v1828_v62 = vmul.f32 %v3575_v3, %v1688_v30  ;;  %v1689_v53 = vmul.f32 %v1561_v52, %v4163_v24  ;;  %v1562_v9 = vadd.f32 1.0, %v3082_v45 }
 0x195   : > { %4880 = vst [vmem:[#allocation38_spill] sm:$0xff] %v4265_v46  ;;  %v4270_v63 = vpop.f32.mrb[63].mxu0  ;;  %v4272_v15 = vpop.f32.mrb[63].mxu1  ;;  %v2764_v1 = vpack.c.bf16 %v1903_v35, %v1902_v12  ;;  %v1904_v40 = vadd.f32 %v3577_v6, %v1764_v5  ;;  %v1765_v4 = vmul.f32 %v3579_v10, %v1625_v21  ;;  %v1626_v46 = vmul.f32 %v1498_v58, %v4171_v2 }
 0x196   : > { %4881 = vst [vmem:[#allocation39_spill] sm:$0xff] %v4270_v63  ;;  %4882 = vst [vmem:[#allocation40_spill] sm:$0xff] %v4272_v15  ;;  %v3086_v51 = vpop.eup %3085  ;;  %v2796_v43 = vpack.c.bf16 %v1967_v25, %v1966_v56  ;;  %v1968_v30 = vadd.f32 %v3577_v6, %v1828_v62  ;;  %v1829_v24 = vmul.f32 %v3579_v10, %v1689_v53  ;;  %v1499_v35 = vadd.f32 1.0, %v3084_v23 }
 0x197   : > { %v3088_v0 = vpop.eup %3087  ;;  %v1690_v52 = vmul.f32 %v1562_v9, %v4174_v38  ;;  %2401 = vst [vmem:[%s3662_s30 + $0x68] sm:$0xff] %v2764_v1  ;;  %v1905_v15 = vadd.f32 %v3581_v11, %v1765_v4  ;;  %v1766_v12 = vmul.f32 %v3575_v3, %v1626_v46  ;;  %v1563_v5 = vadd.f32 1.0, %v3086_v51 }
 0x198   : > { %v3090_v45 = vpop.eup %3089  ;;  %2433 = vst [vmem:[%s3662_s30 + $0x168] sm:$0xff] %v2796_v43  ;;  %v1969_v2 = vadd.f32 %v3581_v11, %v1829_v24  ;;  %v1500_v21 = vadd.f32 1.0, %v3088_v0  ;;  %v1627_v62 = vmul.f32 %v1499_v35, %v4180_v13  ;;  %3099 = verf.f32 %v4232_v42 }
 0x199   : > { %v3092_v63 = vpop.eup %3091  ;;  %v1830_v56 = vmul.f32 %v3575_v3, %v1690_v52  ;;  %v1564_v58 = vadd.f32 1.0, %v3090_v45  ;;  %v2765_v38 = vpack.c.bf16 %v1905_v15, %v1904_v40  ;;  %v1906_v9 = vadd.f32 %v3577_v6, %v1766_v12 }
 0x19a   : > { %v3094_v25 = vpop.eup %3093  ;;  %v1691_v46 = vmul.f32 %v1563_v5, %v4184_v8  ;;  %v2797_v53 = vpack.c.bf16 %v1969_v2, %v1968_v30  ;;  %v1628_v51 = vmul.f32 %v1500_v21, %v4190_v19  ;;  %v1767_v0 = vmul.f32 %v3579_v10, %v1627_v62 }
 0x19b   : > { %v3096_v23 = vpop.eup %3095  ;;  %v1970_v43 = vadd.f32 %v3577_v6, %v1830_v56  ;;  %v1692_v1 = vmul.f32 %v1564_v58, %v4194_v18  ;;  %2402 = vst [vmem:[%s3662_s30 + $0x70] sm:$0xff] %v2765_v38  ;;  %v1501_v40 = vadd.f32 1.0, %v3092_v63  ;;  %v1565_v24 = vadd.f32 1.0, %v3094_v25 }
 0x19c   : > { %v3098_v4 = vpop.eup %3097  ;;  %v1831_v15 = vmul.f32 %v3579_v10, %v1691_v46  ;;  %2434 = vst [vmem:[%s3662_s30 + $0x170] sm:$0xff] %v2797_v53  ;;  %v1768_v13 = vmul.f32 %v3575_v3, %v1628_v51  ;;  %v1502_v30 = vadd.f32 1.0, %v3096_v23  ;;  %v1907_v45 = vadd.f32 %v3581_v11, %v1767_v0 }
 0x19d   : > { %v1832_v8 = vmul.f32 %v3575_v3, %v1692_v1  ;;  %v1566_v52 = vadd.f32 1.0, %v3098_v4  ;;  %v1629_v18 = vmul.f32 %v1501_v40, %v4198_v60  ;;  %v1693_v12 = vmul.f32 %v1565_v24, %v4202_v44  ;;  %v4885_v40 = vld [vmem:[#allocation11_spill] sm:$0xff] }
 0x19e   : > { %v1971_v19 = vadd.f32 %v3581_v11, %v1831_v15  ;;  %v1908_v63 = vadd.f32 %v3577_v6, %v1768_v13  ;;  %v1630_v5 = vmul.f32 %v1502_v30, %v4210_v7  ;;  %v2766_v56 = vpack.c.bf16 %v1907_v45, %v1906_v9 }
 0x19f   : > { %v1972_v35 = vadd.f32 %v3577_v6, %v1832_v8  ;;  %v1694_v2 = vmul.f32 %v1566_v52, %v4218_v29  ;;  %v1769_v58 = vmul.f32 %v3579_v10, %v1629_v18  ;;  %v1833_v25 = vmul.f32 %v3579_v10, %v1693_v12  ;;  %v4886_v8 = vld [vmem:[#allocation12_spill] sm:$0xff]  ;;  %v4887_v52 = vld [vmem:[#allocation13_spill] sm:$0xff]  ;;  %v4888_v18 = vld [vmem:[#allocation14_spill] sm:$0xff] }
 0x1a0   : > { %v2798_v21 = vpack.c.bf16 %v1971_v19, %v1970_v43  ;;  %v1770_v38 = vmul.f32 %v3575_v3, %v1630_v5  ;;  %v1183_v44 = vmul.f32 0.5, %v3921_v16  ;;  %2403 = vst [vmem:[%s3662_s30 + $0x78] sm:$0xff] %v2766_v56  ;;  %3101 = verf.f32 %v4235_v48 }
 0x1a1   : > { %v1834_v60 = vmul.f32 %v3575_v3, %v1694_v2  ;;  %v1909_v7 = vadd.f32 %v3581_v11, %v1769_v58  ;;  %v1973_v29 = vadd.f32 %v3581_v11, %v1833_v25  ;;  %v1312_v9 = vmul.f32 0.70710677, %v3958_v31 }
 0x1a2   : > { %2435 = vst [vmem:[%s3662_s30 + $0x178] sm:$0xff] %v2798_v21  ;;  %v4319_v62 = vadd.f32 %v3577_v6, %v1770_v38  ;;  %v1120_v46 = vmul.f32 0.5, %v3956_v59  ;;  %3103 = verf.f32 %v4243_v55  ;;  %v1184_v16 = vmul.f32 0.5, %v3958_v31  ;;  %v4883_v55 = vld [vmem:[#allocation9_spill] sm:$0xff]  ;;  %v3100_v2 = vpop.eup %3099 }
 0x1a3   : > { %v2767_v42 = vpack.c.bf16 %v1909_v7, %v1908_v63  ;;  %v2799_v23 = vpack.c.bf16 %v1973_v29, %v1972_v35  ;;  %3105 = verf.f32 %v1312_v9  ;;  %v1249_v53 = vmul.f32 0.70710677, %v3965_v41  ;;  %v4889_v35 = vld [vmem:[#allocation15_spill] sm:$0xff] }
 0x1a4   : > { %v4326_v43 = vadd.f32 %v3577_v6, %v1834_v60  ;;  %v4329_v48 = vmul.f32 0.5, %v3965_v41  ;;  %v1313_v51 = vmul.f32 0.70710677, %v3971_v20  ;;  %v1250_v1 = vmul.f32 0.70710677, %v3973_v50  ;;  %v4884_v41 = vld [vmem:[#allocation10_spill] sm:$0xff] }
 0x1a5   : > { %2404 = vst [vmem:[%s3662_s30 + $0x80] sm:$0xff] %v2767_v42  ;;  %2436 = vst [vmem:[%s3662_s30 + $0x180] sm:$0xff] %v2799_v23  ;;  %3107 = verf.f32 %v1249_v53  ;;  %v4336_v59 = vmul.f32 0.5, %v3971_v20  ;;  %v4339_v31 = vmul.f32 0.5, %v3973_v50  ;;  %v1314_v4 = vmul.f32 0.70710677, %v4883_v55 }
 0x1a6   : > { %3109 = verf.f32 %v1313_v51  ;;  %v4343_v0 = vmul.f32 0.5, %v4883_v55  ;;  %v1251_v15 = vmul.f32 0.70710677, %v4884_v41  ;;  %v1315_v24 = vmul.f32 0.70710677, %v4885_v40  ;;  %v4890_v42 = vld [vmem:[#allocation16_spill] sm:$0xff] }
 0x1a7   : > { %3111 = verf.f32 %v1250_v1  ;;  %v4348_v13 = vmul.f32 0.5, %v4884_v41  ;;  %v4351_v20 = vmul.f32 0.5, %v4885_v40  ;;  %v1252_v50 = vmul.f32 0.70710677, %v4886_v8  ;;  %v4891_v55 = vld [vmem:[#allocation17_spill] sm:$0xff] }
 0x1a8   : > { %3113 = verf.f32 %v1314_v4  ;;  %v4355_v30 = vmul.f32 0.5, %v4886_v8  ;;  %v4358_v45 = vmul.f32 0.5, %v4887_v52  ;;  %v1316_v19 = vmul.f32 0.70710677, %v4887_v52 }
 0x1a9   : > { %3115 = verf.f32 %v1251_v15  ;;  %v4362_v12 = vmul.f32 0.5, %v4888_v18  ;;  %v1253_v63 = vmul.f32 0.70710677, %v4888_v18  ;;  %v4366_v5 = vmul.f32 0.5, %v4889_v35 }
 0x1aa   : > { %3117 = verf.f32 %v1315_v24  ;;  %v1317_v56 = vmul.f32 0.70710677, %v4889_v35  ;;  %v4370_v21 = vmul.f32 0.5, %v4026_v14  ;;  %v1254_v58 = vmul.f32 0.70710677, %v4026_v14  ;;  %v3102_v25 = vpop.eup %3101 }
 0x1ab   : > { %v1503_v38 = vadd.f32 1.0, %v3100_v2  ;;  %3119 = verf.f32 %v1252_v50  ;;  %v4374_v60 = vmul.f32 0.5, %v4028_v57  ;;  %v1318_v7 = vmul.f32 0.70710677, %v4028_v57 }
 0x1ac   : > { %v3104_v29 = vpop.eup %3103  ;;  %v1567_v9 = vadd.f32 1.0, %v3102_v25  ;;  %3121 = verf.f32 %v1316_v19  ;;  %v4378_v23 = vmul.f32 0.5, %v4890_v42  ;;  %v1255_v53 = vmul.f32 0.70710677, %v4890_v42 }
 0x1ad   : > { %v3106_v51 = vpop.eup %3105  ;;  %v1631_v1 = vmul.f32 %v1503_v38, %v4225_v37  ;;  %v1504_v14 = vadd.f32 1.0, %v3104_v29  ;;  %3123 = verf.f32 %v1253_v63  ;;  %v4383_v4 = vmul.f32 0.5, %v4891_v55 }
 0x1ae   : > { %v1695_v41 = vmul.f32 %v1567_v9, %v1183_v44  ;;  %v1568_v15 = vadd.f32 1.0, %v3106_v51  ;;  %3125 = verf.f32 %v1317_v56  ;;  %v1319_v57 = vmul.f32 0.70710677, %v4891_v55 }
 0x1af   : > { %v3108_v40 = vpop.eup %3107  ;;  %v1771_v24 = vmul.f32 %v3579_v10, %v1631_v1  ;;  %v1632_v8 = vmul.f32 %v1504_v14, %v1120_v46  ;;  %3127 = verf.f32 %v1254_v58  ;;  %v4388_v50 = vmul.f32 0.70710677, %v4051_v34 }
 0x1b0   : > { %v3110_v52 = vpop.eup %3109  ;;  %v1835_v37 = vmul.f32 %v3579_v10, %v1695_v41  ;;  %v1696_v19 = vmul.f32 %v1568_v15, %v1184_v16  ;;  %v1505_v18 = vadd.f32 1.0, %v3108_v40  ;;  %3129 = verf.f32 %v1318_v7 }
 0x1b1   : > { %v3112_v63 = vpop.eup %3111  ;;  %v1911_v44 = vadd.f32 %v3581_v11, %v1771_v24  ;;  %v1772_v35 = vmul.f32 %v3575_v3, %v1632_v8  ;;  %v1569_v2 = vadd.f32 1.0, %v3110_v52  ;;  %3131 = verf.f32 %v1255_v53 }
 0x1b2   : > { %v3114_v56 = vpop.eup %3113  ;;  %v1975_v46 = vadd.f32 %v3581_v11, %v1835_v37  ;;  %v1836_v58 = vmul.f32 %v3575_v3, %v1696_v19  ;;  %v1633_v25 = vmul.f32 %v1505_v18, %v4329_v48  ;;  %v1506_v38 = vadd.f32 1.0, %v3112_v63 }
 0x1b3   : > { %v3116_v29 = vpop.eup %3115  ;;  %v2768_v16 = vpack.c.bf16 %v1911_v44, %v4319_v62  ;;  %v1912_v7 = vadd.f32 %v3577_v6, %v1772_v35  ;;  %v1697_v9 = vmul.f32 %v1569_v2, %v4336_v59  ;;  %v1570_v42 = vadd.f32 1.0, %v3114_v56 }
 0x1b4   : > { %v3118_v51 = vpop.eup %3117  ;;  %v2800_v53 = vpack.c.bf16 %v1975_v46, %v4326_v43  ;;  %v1976_v1 = vadd.f32 %v3577_v6, %v1836_v58  ;;  %v1773_v14 = vmul.f32 %v3579_v10, %v1633_v25  ;;  %v1634_v55 = vmul.f32 %v1506_v38, %v4339_v31 }
 0x1b5   : > { %v3120_v48 = vpop.eup %3119  ;;  %2405 = vst [vmem:[%s3662_s30 + $0x88] sm:$0xff] %v2768_v16  ;;  %v1837_v41 = vmul.f32 %v3579_v10, %v1697_v9  ;;  %v1698_v62 = vmul.f32 %v1570_v42, %v4343_v0  ;;  %v1507_v15 = vadd.f32 1.0, %v3116_v29  ;;  %v1571_v40 = vadd.f32 1.0, %v3118_v51 }
 0x1b6   : > { %v3122_v24 = vpop.eup %3121  ;;  %2437 = vst [vmem:[%s3662_s30 + $0x188] sm:$0xff] %v2800_v53  ;;  %v1913_v59 = vadd.f32 %v3581_v11, %v1773_v14  ;;  %v1774_v43 = vmul.f32 %v3575_v3, %v1634_v55  ;;  %v1508_v8 = vadd.f32 1.0, %v3120_v48  ;;  %3133 = verf.f32 %v1319_v57 }
 0x1b7   : > { %v3124_v52 = vpop.eup %3123  ;;  %v1977_v31 = vadd.f32 %v3581_v11, %v1837_v41  ;;  %v1838_v37 = vmul.f32 %v3575_v3, %v1698_v62  ;;  %v1635_v19 = vmul.f32 %v1507_v15, %v4348_v13  ;;  %v1699_v0 = vmul.f32 %v1571_v40, %v4351_v20 }
 0x1b8   : > { %v3126_v18 = vpop.eup %3125  ;;  %v2769_v63 = vpack.c.bf16 %v1913_v59, %v1912_v7  ;;  %v1914_v44 = vadd.f32 %v3577_v6, %v1774_v43  ;;  %v1636_v35 = vmul.f32 %v1508_v8, %v4355_v30  ;;  %v1572_v2 = vadd.f32 1.0, %v3122_v24 }
 0x1b9   : > { %v3128_v56 = vpop.eup %3127  ;;  %v2801_v57 = vpack.c.bf16 %v1977_v31, %v1976_v1  ;;  %v1978_v46 = vadd.f32 %v3577_v6, %v1838_v37  ;;  %v1775_v58 = vmul.f32 %v3579_v10, %v1635_v19  ;;  %v1839_v25 = vmul.f32 %v3579_v10, %v1699_v0 }
 0x1ba   : > { %v3130_v38 = vpop.eup %3129  ;;  %2406 = vst [vmem:[%s3662_s30 + $0x90] sm:$0xff] %v2769_v63  ;;  %v1776_v13 = vmul.f32 %v3575_v3, %v1636_v35  ;;  %v1700_v20 = vmul.f32 %v1572_v2, %v4358_v45  ;;  %v1509_v29 = vadd.f32 1.0, %v3124_v52  ;;  %v1573_v16 = vadd.f32 1.0, %v3126_v18 }
 0x1bb   : > { %v3132_v7 = vpop.eup %3131  ;;  %2438 = vst [vmem:[%s3662_s30 + $0x190] sm:$0xff] %v2801_v57  ;;  %v1915_v30 = vadd.f32 %v3581_v11, %v1775_v58  ;;  %v1979_v9 = vadd.f32 %v3581_v11, %v1839_v25  ;;  %v1510_v42 = vadd.f32 1.0, %v3128_v56  ;;  %v1574_v51 = vadd.f32 1.0, %v3130_v38 }
 0x1bc   : > { %v1916_v53 = vadd.f32 %v3577_v6, %v1776_v13  ;;  %v1840_v1 = vmul.f32 %v3575_v3, %v1700_v20  ;;  %v1637_v14 = vmul.f32 %v1509_v29, %v4362_v12  ;;  %v1701_v45 = vmul.f32 %v1573_v16, %v4366_v5  ;;  %v4893_v13 = vld [vmem:[#allocation19_spill] sm:$0xff]  ;;  %v4894_v16 = vld [vmem:[#allocation20_spill] sm:$0xff] }
 0x1bd   : > { %v2770_v55 = vpack.c.bf16 %v1915_v30, %v1914_v44  ;;  %v2802_v48 = vpack.c.bf16 %v1979_v9, %v1978_v46  ;;  %v1638_v41 = vmul.f32 %v1510_v42, %v4370_v21  ;;  %v1702_v62 = vmul.f32 %v1574_v51, %v4374_v60 }
 0x1be   : > { %v1980_v15 = vadd.f32 %v3577_v6, %v1840_v1  ;;  %v1777_v40 = vmul.f32 %v3579_v10, %v1637_v14  ;;  %v1841_v24 = vmul.f32 %v3579_v10, %v1701_v45  ;;  %v1511_v59 = vadd.f32 1.0, %v3132_v7 }
 0x1bf   : > { %2407 = vst [vmem:[%s3662_s30 + $0x98] sm:$0xff] %v2770_v55  ;;  %2439 = vst [vmem:[%s3662_s30 + $0x198] sm:$0xff] %v2802_v48  ;;  %v1778_v43 = vmul.f32 %v3575_v3, %v1638_v41  ;;  %v1842_v12 = vmul.f32 %v3575_v3, %v1702_v62  ;;  %3135 = verf.f32 %v4388_v50  ;;  %v1320_v5 = vmul.f32 0.70710677, %v4053_v36 }
 0x1c0   : > { %v3134_v21 = vpop.eup %3133  ;;  %v1917_v60 = vadd.f32 %v3581_v11, %v1777_v40  ;;  %v1981_v8 = vadd.f32 %v3581_v11, %v1841_v24  ;;  %v1639_v52 = vmul.f32 %v1511_v59, %v4378_v23  ;;  %v1128_v31 = vmul.f32 0.5, %v4051_v34 }
 0x1c1   : > { %v1918_v37 = vadd.f32 %v3577_v6, %v1778_v43  ;;  %v1575_v19 = vadd.f32 1.0, %v3134_v21  ;;  %v1192_v0 = vmul.f32 0.5, %v4053_v36  ;;  %3137 = verf.f32 %v1320_v5  ;;  %v4895_v5 = vld [vmem:[#allocation21_spill] sm:$0xff] }
 0x1c2   : > { %v2771_v50 = vpack.c.bf16 %v1917_v60, %v1916_v53  ;;  %v2803_v18 = vpack.c.bf16 %v1981_v8, %v1980_v15  ;;  %v1779_v63 = vmul.f32 %v3579_v10, %v1639_v52  ;;  %v1257_v44 = vmul.f32 0.70710677, %v4058_v47 }
 0x1c3   : > { %v1982_v35 = vadd.f32 %v3577_v6, %v1842_v12  ;;  %v1703_v2 = vmul.f32 %v1575_v19, %v4383_v4  ;;  %v4450_v23 = vmul.f32 0.5, %v4058_v47  ;;  %v1321_v34 = vmul.f32 0.70710677, %v4060_v61  ;;  %v4892_v47 = vld [vmem:[#allocation18_spill] sm:$0xff] }
 0x1c4   : > { %2408 = vst [vmem:[%s3662_s30 + $0xa0] sm:$0xff] %v2771_v50  ;;  %2440 = vst [vmem:[%s3662_s30 + $0x1a0] sm:$0xff] %v2803_v18  ;;  %v1919_v36 = vadd.f32 %v3581_v11, %v1779_v63  ;;  %3139 = verf.f32 %v1257_v44  ;;  %v4457_v56 = vmul.f32 0.5, %v4060_v61  ;;  %v1258_v57 = vmul.f32 0.70710677, %v4065_v39 }
 0x1c5   : > { %v1843_v46 = vmul.f32 %v3579_v10, %v1703_v2  ;;  %3141 = verf.f32 %v1321_v34  ;;  %v4462_v4 = vmul.f32 0.5, %v4065_v39  ;;  %v1322_v58 = vmul.f32 0.70710677, %v4892_v47 }
 0x1c6   : > { %v2772_v25 = vpack.c.bf16 %v1919_v36, %v1918_v37  ;;  %3143 = verf.f32 %v1258_v57  ;;  %v4466_v38 = vmul.f32 0.5, %v4892_v47  ;;  %v1259_v20 = vmul.f32 0.70710677, %v4893_v13 }
 0x1c7   : > { %v1983_v61 = vadd.f32 %v3581_v11, %v1843_v46  ;;  %3145 = verf.f32 %v1322_v58  ;;  %v4471_v29 = vmul.f32 0.5, %v4893_v13  ;;  %v1323_v7 = vmul.f32 0.70710677, %v4894_v16 }
 0x1c8   : > { %2409 = vst [vmem:[%s3662_s30 + $0xa8] sm:$0xff] %v2772_v25  ;;  %3147 = verf.f32 %v1259_v20  ;;  %v4476_v39 = vmul.f32 0.5, %v4894_v16  ;;  %v1260_v30 = vmul.f32 0.70710677, %v4091_v26  ;;  %v1324_v9 = vmul.f32 0.70710677, %v4093_v17 }
 0x1c9   : > { %v3136_v42 = vpop.eup %3135  ;;  %v2804_v51 = vpack.c.bf16 %v1983_v61, %v1982_v35  ;;  %3149 = verf.f32 %v1323_v7  ;;  %v4481_v53 = vmul.f32 0.5, %v4091_v26  ;;  %v1261_v1 = vmul.f32 0.70710677, %v4098_v49  ;;  %v4897_v61 = vld [vmem:[#allocation23_spill] sm:$0xff] }
 0x1ca   : > { %v1512_v14 = vadd.f32 1.0, %v3136_v42  ;;  %3151 = verf.f32 %v1260_v30  ;;  %v4485_v45 = vmul.f32 0.5, %v4093_v17  ;;  %v1325_v55 = vmul.f32 0.70710677, %v4100_v32 }
 0x1cb   : > { %v3138_v48 = vpop.eup %3137  ;;  %2441 = vst [vmem:[%s3662_s30 + $0x1a8] sm:$0xff] %v2804_v51  ;;  %3153 = verf.f32 %v1324_v9  ;;  %v4490_v41 = vmul.f32 0.5, %v4098_v49  ;;  %v4493_v62 = vmul.f32 0.5, %v4100_v32  ;;  %v1262_v26 = vmul.f32 0.70710677, %v4106_v28 }
 0x1cc   : > { %v1640_v15 = vmul.f32 %v1512_v14, %v1128_v31  ;;  %v1576_v40 = vadd.f32 1.0, %v3138_v48  ;;  %3155 = verf.f32 %v1261_v1  ;;  %v1326_v24 = vmul.f32 0.70710677, %v4108_v54 }
 0x1cd   : > { %3157 = verf.f32 %v1325_v55  ;;  %v4498_v17 = vmul.f32 0.5, %v4106_v28  ;;  %v4501_v59 = vmul.f32 0.5, %v4108_v54  ;;  %v1263_v49 = vmul.f32 0.70710677, %v4114_v33  ;;  %v4896_v28 = vld [vmem:[#allocation22_spill] sm:$0xff] }
 0x1ce   : > { %v3140_v43 = vpop.eup %3139  ;;  %v1780_v32 = vmul.f32 %v3575_v3, %v1640_v15  ;;  %v1704_v12 = vmul.f32 %v1576_v40, %v1192_v0  ;;  %3159 = verf.f32 %v1262_v26  ;;  %v1327_v21 = vmul.f32 0.70710677, %v4895_v5 }
 0x1cf   : > { %v3142_v60 = vpop.eup %3141  ;;  %v1513_v8 = vadd.f32 1.0, %v3140_v43  ;;  %3161 = verf.f32 %v1326_v24  ;;  %v4507_v52 = vmul.f32 0.5, %v4114_v33  ;;  %v1264_v31 = vmul.f32 0.70710677, %v4896_v28 }
 0x1d0   : > { %v3144_v37 = vpop.eup %3143  ;;  %v1844_v54 = vmul.f32 %v3575_v3, %v1704_v12  ;;  %v1577_v19 = vadd.f32 1.0, %v3142_v60  ;;  %3163 = verf.f32 %v1263_v49  ;;  %v4512_v50 = vmul.f32 0.5, %v4895_v5 }
 0x1d1   : > { %v3146_v0 = vpop.eup %3145  ;;  %v1641_v18 = vmul.f32 %v1513_v8, %v4450_v23  ;;  %v1514_v63 = vadd.f32 1.0, %v3144_v37  ;;  %3165 = verf.f32 %v1327_v21  ;;  %v4516_v44 = vmul.f32 0.5, %v4896_v28 }
 0x1d2   : > { %v3148_v33 = vpop.eup %3147  ;;  %v1920_v35 = vadd.f32 %v3577_v6, %v1780_v32  ;;  %v1705_v2 = vmul.f32 %v1577_v19, %v4457_v56  ;;  %v1578_v34 = vadd.f32 1.0, %v3146_v0  ;;  %3167 = verf.f32 %v1264_v31 }
 0x1d3   : > { %v3150_v36 = vpop.eup %3149  ;;  %v1984_v57 = vadd.f32 %v3577_v6, %v1844_v54  ;;  %v1781_v46 = vmul.f32 %v3579_v10, %v1641_v18  ;;  %v1642_v47 = vmul.f32 %v1514_v63, %v4462_v4  ;;  %v1515_v23 = vadd.f32 1.0, %v3148_v33 }
 0x1d4   : > { %v3152_v58 = vpop.eup %3151  ;;  %v1845_v25 = vmul.f32 %v3579_v10, %v1705_v2  ;;  %v1706_v13 = vmul.f32 %v1578_v34, %v4466_v38  ;;  %v1579_v20 = vadd.f32 1.0, %v3150_v36  ;;  %v1328_v16 = vmul.f32 0.70710677, %v4897_v61 }
 0x1d5   : > { %v3154_v7 = vpop.eup %3153  ;;  %v1921_v56 = vadd.f32 %v3581_v11, %v1781_v46  ;;  %v1782_v30 = vmul.f32 %v3575_v3, %v1642_v47  ;;  %v1643_v9 = vmul.f32 %v1515_v23, %v4471_v29  ;;  %v1516_v42 = vadd.f32 1.0, %v3152_v58 }
 0x1d6   : > { %v3156_v51 = vpop.eup %3155  ;;  %v1985_v4 = vadd.f32 %v3581_v11, %v1845_v25  ;;  %v1846_v1 = vmul.f32 %v3575_v3, %v1706_v13  ;;  %v1707_v14 = vmul.f32 %v1579_v20, %v4476_v39  ;;  %v1580_v38 = vadd.f32 1.0, %v3154_v7 }
 0x1d7   : > { %v3158_v55 = vpop.eup %3157  ;;  %v2773_v48 = vpack.c.bf16 %v1921_v56, %v1920_v35  ;;  %v1922_v26 = vadd.f32 %v3577_v6, %v1782_v30  ;;  %v1783_v15 = vmul.f32 %v3579_v10, %v1643_v9  ;;  %v1644_v40 = vmul.f32 %v1516_v42, %v4481_v53  ;;  %v4898_v56 = vld [vmem:[#allocation24_spill] sm:$0xff] }
 0x1d8   : > { %v3160_v29 = vpop.eup %3159  ;;  %v2805_v24 = vpack.c.bf16 %v1985_v4, %v1984_v57  ;;  %v1986_v49 = vadd.f32 %v3577_v6, %v1846_v1  ;;  %v1847_v43 = vmul.f32 %v3579_v10, %v1707_v14  ;;  %v1708_v32 = vmul.f32 %v1580_v38, %v4485_v45  ;;  %v4899_v4 = vld [vmem:[#allocation25_spill] sm:$0xff]  ;;  %v4900_v14 = vld [vmem:[#allocation6_spill] sm:$0xff] }
 0x1d9   : > { %v3162_v12 = vpop.eup %3161  ;;  %2410 = vst [vmem:[%s3662_s30 + $0xb0] sm:$0xff] %v2773_v48  ;;  %v1923_v39 = vadd.f32 %v3581_v11, %v1783_v15  ;;  %v1784_v5 = vmul.f32 %v3575_v3, %v1644_v40  ;;  %v1517_v21 = vadd.f32 1.0, %v3156_v51  ;;  %v1581_v60 = vadd.f32 1.0, %v3158_v55 }
 0x1da   : > { %v3164_v8 = vpop.eup %3163  ;;  %2442 = vst [vmem:[%s3662_s30 + $0x1b0] sm:$0xff] %v2805_v24  ;;  %v1987_v53 = vadd.f32 %v3581_v11, %v1847_v43  ;;  %v1848_v28 = vmul.f32 %v3575_v3, %v1708_v32  ;;  %v1518_v31 = vadd.f32 1.0, %v3160_v29  ;;  %v1582_v37 = vadd.f32 1.0, %v3162_v12  ;;  %v4902_v43 = vld [vmem:[#allocation7_spill] sm:$0xff]  ;;  %v4903_v12 = vld [vmem:[#allocation8_spill] sm:$0xff] }
 0x1db   : > { %v3166_v54 = vpop.eup %3165  ;;  %v2774_v45 = vpack.c.bf16 %v1923_v39, %v1922_v26  ;;  %v1924_v19 = vadd.f32 %v3577_v6, %v1784_v5  ;;  %v1645_v0 = vmul.f32 %v1517_v21, %v4490_v41  ;;  %v1709_v18 = vmul.f32 %v1581_v60, %v4493_v62  ;;  %v4901_v26 = vld [vmem:[#allocation26_spill] sm:$0xff]  ;;  %v4904_v21 = vld [vmem:[#allocation27_spill] sm:$0xff] }
 0x1dc   : > { %v3168_v63 = vpop.eup %3167  ;;  %v2806_v33 = vpack.c.bf16 %v1987_v53, %v1986_v49  ;;  %v1988_v35 = vadd.f32 %v3577_v6, %v1848_v28  ;;  %v1646_v2 = vmul.f32 %v1518_v31, %v4498_v17  ;;  %v1710_v34 = vmul.f32 %v1582_v37, %v4501_v59 }
 0x1dd   : > { %2411 = vst [vmem:[%s3662_s30 + $0xb8] sm:$0xff] %v2774_v45  ;;  %v1785_v36 = vmul.f32 %v3579_v10, %v1645_v0  ;;  %v1849_v57 = vmul.f32 %v3579_v10, %v1709_v18  ;;  %v1519_v46 = vadd.f32 1.0, %v3164_v8  ;;  %v1583_v47 = vadd.f32 1.0, %v3166_v54  ;;  %v4905_v8 = vld [vmem:[#allocation28_spill] sm:$0xff]  ;;  %v4906_v54 = vld [vmem:[#allocation29_spill] sm:$0xff]  ;;  %v4907_v18 = vld [vmem:[#allocation30_spill] sm:$0xff] }
 0x1de   : > { %2443 = vst [vmem:[%s3662_s30 + $0x1b8] sm:$0xff] %v2806_v33  ;;  %v1786_v41 = vmul.f32 %v3575_v3, %v1646_v2  ;;  %v1850_v62 = vmul.f32 %v3575_v3, %v1710_v34  ;;  %v1520_v23 = vadd.f32 1.0, %v3168_v63  ;;  %3169 = verf.f32 %v1328_v16  ;;  %v4908_v2 = vld [vmem:[#allocation31_spill] sm:$0xff] }
 0x1df   : > { %v1925_v17 = vadd.f32 %v3581_v11, %v1785_v36  ;;  %v1989_v59 = vadd.f32 %v3581_v11, %v1849_v57  ;;  %v1647_v58 = vmul.f32 %v1519_v46, %v4507_v52  ;;  %v1711_v25 = vmul.f32 %v1583_v47, %v4512_v50  ;;  %v4909_v46 = vld [vmem:[#allocation32_spill] sm:$0xff] }
 0x1e0   : > { %v1926_v13 = vadd.f32 %v3577_v6, %v1786_v41  ;;  %v1990_v20 = vadd.f32 %v3577_v6, %v1850_v62  ;;  %v1648_v7 = vmul.f32 %v1520_v23, %v4516_v44  ;;  %v1265_v30 = vmul.f32 0.70710677, %v4898_v56 }
 0x1e1   : > { %v2775_v9 = vpack.c.bf16 %v1925_v17, %v1924_v19  ;;  %v2807_v42 = vpack.c.bf16 %v1989_v59, %v1988_v35  ;;  %v1787_v16 = vmul.f32 %v3579_v10, %v1647_v58  ;;  %v1851_v51 = vmul.f32 %v3579_v10, %v1711_v25  ;;  %v4910_v17 = vld [vmem:[#allocation33_spill] sm:$0xff] }
 0x1e2   : > { %3171 = verf.f32 %v1265_v30  ;;  %v1329_v1 = vmul.f32 0.70710677, %v4899_v4  ;;  %v1788_v44 = vmul.f32 %v3575_v3, %v1648_v7  ;;  %v1266_v38 = vmul.f32 0.70710677, %v4900_v14 }
 0x1e3   : > { %2412 = vst [vmem:[%s3662_s30 + $0xc0] sm:$0xff] %v2775_v9  ;;  %2444 = vst [vmem:[%s3662_s30 + $0x1c0] sm:$0xff] %v2807_v42  ;;  %v1927_v52 = vadd.f32 %v3581_v11, %v1787_v16  ;;  %v1991_v50 = vadd.f32 %v3581_v11, %v1851_v51  ;;  %v1200_v55 = vmul.f32 0.5, %v4897_v61  ;;  %v1137_v48 = vmul.f32 0.5, %v4898_v56 }
 0x1e4   : > { %3173 = verf.f32 %v1329_v1  ;;  %v1330_v15 = vmul.f32 0.70710677, %v4901_v26  ;;  %v1201_v24 = vmul.f32 0.5, %v4899_v4  ;;  %v1138_v49 = vmul.f32 0.5, %v4900_v14 }
 0x1e5   : > { %v2776_v40 = vpack.c.bf16 %v1927_v52, %v1926_v13  ;;  %v2808_v29 = vpack.c.bf16 %v1991_v50, %v1990_v20  ;;  %3175 = verf.f32 %v1266_v38  ;;  %v1267_v32 = vmul.f32 0.70710677, %v4902_v43  ;;  %v4911_v13 = vld [vmem:[#allocation34_spill] sm:$0xff] }
 0x1e6   : > { %3177 = verf.f32 %v1330_v15  ;;  %v1331_v39 = vmul.f32 0.70710677, %v4903_v12  ;;  %v4583_v61 = vadd.f32 %v3577_v6, %v1788_v44  ;;  %v1202_v5 = vmul.f32 0.5, %v4901_v26 }
 0x1e7   : > { %2413 = vst [vmem:[%s3662_s30 + $0xc8] sm:$0xff] %v2776_v40  ;;  %2445 = vst [vmem:[%s3662_s30 + $0x1c8] sm:$0xff] %v2808_v29  ;;  %v1268_v60 = vmul.f32 0.70710677, %v4904_v21  ;;  %v1332_v53 = vmul.f32 0.70710677, %v4905_v8  ;;  %3179 = verf.f32 %v1267_v32 }
 0x1e8   : > { %v3170_v28 = vpop.eup %3169  ;;  %v4589_v31 = vmul.f32 0.5, %v4902_v43  ;;  %v4592_v37 = vmul.f32 0.5, %v4903_v12  ;;  %v1269_v45 = vmul.f32 0.70710677, %v4906_v54  ;;  %3181 = verf.f32 %v1331_v39  ;;  %v4913_v29 = vld [vmem:[#allocation36_spill] sm:$0xff] }
 0x1e9   : > { %v1584_v19 = vadd.f32 1.0, %v3170_v28  ;;  %v4596_v0 = vmul.f32 0.5, %v4904_v21  ;;  %v1333_v63 = vmul.f32 0.70710677, %v4907_v18  ;;  %3183 = verf.f32 %v1268_v60 }
 0x1ea   : > { %v4600_v33 = vmul.f32 0.5, %v4905_v8  ;;  %v4603_v35 = vmul.f32 0.5, %v4906_v54  ;;  %v1270_v34 = vmul.f32 0.70710677, %v4908_v2  ;;  %3185 = verf.f32 %v1332_v53  ;;  %v4914_v53 = vld [vmem:[#allocation37_spill] sm:$0xff] }
 0x1eb   : > { %v1712_v36 = vmul.f32 %v1584_v19, %v1200_v55  ;;  %v4607_v57 = vmul.f32 0.5, %v4907_v18  ;;  %v1334_v47 = vmul.f32 0.70710677, %v4909_v46  ;;  %3187 = verf.f32 %v1269_v45 }
 0x1ec   : > { %v3172_v41 = vpop.eup %3171  ;;  %v4611_v62 = vmul.f32 0.5, %v4908_v2  ;;  %v4614_v23 = vmul.f32 0.5, %v4909_v46  ;;  %v1271_v59 = vmul.f32 0.70710677, %v4910_v17  ;;  %3189 = verf.f32 %v1333_v63 }
 0x1ed   : > { %v1852_v58 = vmul.f32 %v3575_v3, %v1712_v36  ;;  %v1521_v25 = vadd.f32 1.0, %v3172_v41  ;;  %v1335_v20 = vmul.f32 0.70710677, %v4911_v13  ;;  %3191 = verf.f32 %v1270_v34 }
 0x1ee   : > { %v3174_v7 = vpop.eup %3173  ;;  %v4620_v56 = vmul.f32 0.5, %v4910_v17  ;;  %v4623_v30 = vmul.f32 0.5, %v4911_v13  ;;  %v1272_v9 = vmul.f32 0.70710677, %v4249_v27  ;;  %3193 = verf.f32 %v1334_v47 }
 0x1ef   : > { %v3176_v42 = vpop.eup %3175  ;;  %v1649_v16 = vmul.f32 %v1521_v25, %v1137_v48  ;;  %v1585_v51 = vadd.f32 1.0, %v3174_v7  ;;  %v4627_v4 = vmul.f32 0.5, %v4249_v27  ;;  %v1992_v52 = vadd.f32 %v3577_v6, %v1852_v58  ;;  %v4912_v48 = vld [vmem:[#allocation35_spill] sm:$0xff] }
 0x1f0   : > { %v3178_v1 = vpop.eup %3177  ;;  %v1522_v50 = vadd.f32 1.0, %v3176_v42  ;;  %3195 = verf.f32 %v1271_v59  ;;  %v1336_v44 = vmul.f32 0.70710677, %v4251_v22  ;;  %v1273_v40 = vmul.f32 0.70710677, %v4912_v48 }
 0x1f1   : > { %v1789_v14 = vmul.f32 %v3579_v10, %v1649_v16  ;;  %v1713_v38 = vmul.f32 %v1585_v51, %v1201_v24  ;;  %v1586_v55 = vadd.f32 1.0, %v3178_v1  ;;  %3197 = verf.f32 %v1335_v20  ;;  %v3180_v26 = vpop.eup %3179 }
 0x1f2   : > { %v1650_v15 = vmul.f32 %v1522_v50, %v1138_v49  ;;  %3199 = verf.f32 %v1272_v9  ;;  %v1337_v27 = vmul.f32 0.70710677, %v4913_v29  ;;  %v3182_v43 = vpop.eup %3181  ;;  %v1523_v21 = vadd.f32 1.0, %v3180_v26 }
 0x1f3   : > { %v1929_v32 = vadd.f32 %v3581_v11, %v1789_v14  ;;  %v1853_v12 = vmul.f32 %v3579_v10, %v1713_v38  ;;  %v1714_v39 = vmul.f32 %v1586_v55, %v1202_v5  ;;  %v3184_v60 = vpop.eup %3183  ;;  %v1587_v8 = vadd.f32 1.0, %v3182_v43 }
 0x1f4   : > { %v1790_v24 = vmul.f32 %v3575_v3, %v1650_v15  ;;  %3201 = verf.f32 %v1336_v44  ;;  %v4638_v49 = vmul.f32 0.70710677, %v4914_v53  ;;  %v3186_v28 = vpop.eup %3185  ;;  %v1651_v18 = vmul.f32 %v1523_v21, %v4589_v31 }
 0x1f5   : > { %v2777_v54 = vpack.c.bf16 %v1929_v32, %v4583_v61  ;;  %v1993_v45 = vadd.f32 %v3581_v11, %v1853_v12  ;;  %v1854_v19 = vmul.f32 %v3575_v3, %v1714_v39  ;;  %v3188_v5 = vpop.eup %3187  ;;  %v1715_v2 = vmul.f32 %v1587_v8, %v4592_v37 }
 0x1f6   : > { %v1930_v63 = vadd.f32 %v3577_v6, %v1790_v24  ;;  %v1524_v34 = vadd.f32 1.0, %v3184_v60  ;;  %v1588_v36 = vadd.f32 1.0, %v3186_v28  ;;  %v3190_v46 = vpop.eup %3189  ;;  %v1791_v61 = vmul.f32 %v3579_v10, %v1651_v18 }
 0x1f7   : > { %2414 = vst [vmem:[%s3662_s30 + $0xd0] sm:$0xff] %v2777_v54  ;;  %v2809_v47 = vpack.c.bf16 %v1993_v45, %v1992_v52  ;;  %v1994_v41 = vadd.f32 %v3577_v6, %v1854_v19  ;;  %v1525_v17 = vadd.f32 1.0, %v3188_v5  ;;  %v3192_v59 = vpop.eup %3191  ;;  %v1855_v58 = vmul.f32 %v3579_v10, %v1715_v2 }
 0x1f8   : > { %v1652_v31 = vmul.f32 %v1524_v34, %v4596_v0  ;;  %v1716_v25 = vmul.f32 %v1588_v36, %v4600_v33  ;;  %v1589_v13 = vadd.f32 1.0, %v3190_v46  ;;  %v3194_v20 = vpop.eup %3193  ;;  %v1931_v37 = vadd.f32 %v3581_v11, %v1791_v61  ;;  %v4916_v34 = vld [vmem:[#allocation39_spill] sm:$0xff] }
 0x1f9   : > { %2446 = vst [vmem:[%s3662_s30 + $0x1d0] sm:$0xff] %v2809_v47  ;;  %v1653_v7 = vmul.f32 %v1525_v17, %v4603_v35  ;;  %v1526_v9 = vadd.f32 1.0, %v3192_v59  ;;  %3203 = verf.f32 %v1273_v40  ;;  %v1995_v16 = vadd.f32 %v3581_v11, %v1855_v58  ;;  %v4917_v59 = vld [vmem:[#allocation40_spill] sm:$0xff] }
 0x1fa   : > { %v3196_v42 = vpop.eup %3195  ;;  %v1792_v51 = vmul.f32 %v3575_v3, %v1652_v31  ;;  %v1856_v1 = vmul.f32 %v3575_v3, %v1716_v25  ;;  %v1717_v0 = vmul.f32 %v1589_v13, %v4607_v57  ;;  %v2778_v52 = vpack.c.bf16 %v1931_v37, %v1930_v63  ;;  %v4915_v63 = vld [vmem:[#allocation38_spill] sm:$0xff] }
 0x1fb   : > { %v3198_v33 = vpop.eup %3197  ;;  %v1793_v50 = vmul.f32 %v3579_v10, %v1653_v7  ;;  %v1654_v44 = vmul.f32 %v1526_v9, %v4611_v62  ;;  %v1590_v35 = vadd.f32 1.0, %v3194_v20  ;;  %v2810_v38 = vpack.c.bf16 %v1995_v16, %v1994_v41 }
 0x1fc   : > { %v3200_v14 = vpop.eup %3199  ;;  %v1932_v55 = vadd.f32 %v3577_v6, %v1792_v51  ;;  %v1996_v26 = vadd.f32 %v3577_v6, %v1856_v1  ;;  %v1857_v15 = vmul.f32 %v3579_v10, %v1717_v0  ;;  %2415 = vst [vmem:[%s3662_s30 + $0xd8] sm:$0xff] %v2778_v52  ;;  %v1527_v32 = vadd.f32 1.0, %v3196_v42 }
 0x1fd   : > { %v1933_v40 = vadd.f32 %v3581_v11, %v1793_v50  ;;  %v1794_v57 = vmul.f32 %v3575_v3, %v1654_v44  ;;  %v1718_v43 = vmul.f32 %v1590_v35, %v4614_v23  ;;  %2447 = vst [vmem:[%s3662_s30 + $0x1d8] sm:$0xff] %v2810_v38  ;;  %v1591_v39 = vadd.f32 1.0, %v3198_v33 }
 0x1fe   : > { %v3202_v12 = vpop.eup %3201  ;;  %v1997_v62 = vadd.f32 %v3581_v11, %v1857_v15  ;;  %v1528_v21 = vadd.f32 1.0, %v3200_v14  ;;  %3205 = verf.f32 %v1337_v27  ;;  %v1655_v8 = vmul.f32 %v1527_v32, %v4620_v56 }
 0x1ff   : > { %v2779_v60 = vpack.c.bf16 %v1933_v40, %v1932_v55  ;;  %v1858_v24 = vmul.f32 %v3575_v3, %v1718_v43  ;;  %v1719_v54 = vmul.f32 %v1591_v39, %v4623_v30  ;;  %v1934_v23 = vadd.f32 %v3577_v6, %v1794_v57 }
 0x200   : > { %v2811_v28 = vpack.c.bf16 %v1997_v62, %v1996_v26  ;;  %v1656_v45 = vmul.f32 %v1528_v21, %v4627_v4  ;;  %v1795_v19 = vmul.f32 %v3579_v10, %v1655_v8  ;;  %v1592_v18 = vadd.f32 1.0, %v3202_v12 }
 0x201   : > { %2416 = vst [vmem:[%s3662_s30 + $0xe0] sm:$0xff] %v2779_v60  ;;  %3207 = verf.f32 %v4638_v49  ;;  %v1998_v27 = vadd.f32 %v3577_v6, %v1858_v24  ;;  %v1859_v5 = vmul.f32 %v3579_v10, %v1719_v54  ;;  %v1338_v56 = vmul.f32 0.70710677, %v4915_v63 }
 0x202   : > { %2448 = vst [vmem:[%s3662_s30 + $0x1e0] sm:$0xff] %v2811_v28  ;;  %v1935_v30 = vadd.f32 %v3581_v11, %v1795_v19  ;;  %v1208_v4 = vmul.f32 0.5, %v4251_v22  ;;  %v1275_v36 = vmul.f32 0.70710677, %v4916_v34  ;;  %v1796_v49 = vmul.f32 %v3575_v3, %v1656_v45 }
 0x203   : > { %v3204_v2 = vpop.eup %3203  ;;  %v1999_v46 = vadd.f32 %v3581_v11, %v1859_v5  ;;  %v1145_v47 = vmul.f32 0.5, %v4912_v48  ;;  %3209 = verf.f32 %v1338_v56  ;;  %v1339_v58 = vmul.f32 0.70710677, %v4917_v59 }
 0x204   : > { %v1529_v41 = vadd.f32 1.0, %v3204_v2  ;;  %v2780_v61 = vpack.c.bf16 %v1935_v30, %v1934_v23  ;;  %v1720_v17 = vmul.f32 %v1592_v18, %v1208_v4  ;;  %3211 = verf.f32 %v1275_v36 }
 0x205   : > { %v2812_v31 = vpack.c.bf16 %v1999_v46, %v1998_v27  ;;  %3213 = verf.f32 %v1339_v58  ;;  %v1936_v13 = vadd.f32 %v3577_v6, %v1796_v49  ;;  %v1209_v37 = vmul.f32 0.5, %v4913_v29 }
 0x206   : > { %v1657_v25 = vmul.f32 %v1529_v41, %v1145_v47  ;;  %2417 = vst [vmem:[%s3662_s30 + $0xe8] sm:$0xff] %v2780_v61  ;;  %v1860_v48 = vmul.f32 %v3575_v3, %v1720_v17  ;;  %v1146_v1 = vmul.f32 0.5, %v4914_v53  ;;  %v1210_v14 = vmul.f32 0.5, %v4915_v63 }
 0x207   : > { %2449 = vst [vmem:[%s3662_s30 + $0x1e8] sm:$0xff] %v2812_v31  ;;  %v1147_v53 = vmul.f32 0.5, %v4916_v34  ;;  %v1211_v43 = vmul.f32 0.5, %v4917_v59 }
 0x208   : > { %v3206_v22 = vpop.eup %3205  ;;  %v1797_v20 = vmul.f32 %v3579_v10, %v1657_v25  ;;  %v2000_v33 = vadd.f32 %v3577_v6, %v1860_v48 }
 0x209   : > { %v1593_v7 = vadd.f32 1.0, %v3206_v22 }
 0x20a   : > { %v1937_v9 = vadd.f32 %v3581_v11, %v1797_v20 }
 0x20b   : > { %v3208_v42 = vpop.eup %3207  ;;  %v1721_v16 = vmul.f32 %v1593_v7, %v1209_v37 }
 0x20c   : > { %v2781_v51 = vpack.c.bf16 %v1937_v9, %v1936_v13  ;;  %v1530_v0 = vadd.f32 1.0, %v3208_v42 }
 0x20d   : > { %v1861_v52 = vmul.f32 %v3579_v10, %v1721_v16  ;;  %v3210_v44 = vpop.eup %3209 }
 0x20e   : > { %2418 = vst [vmem:[%s3662_s30 + $0xf0] sm:$0xff] %v2781_v51  ;;  %v1658_v50 = vmul.f32 %v1530_v0, %v1146_v1  ;;  %v3212_v29 = vpop.eup %3211  ;;  %v1594_v38 = vadd.f32 1.0, %v3210_v44 }
 0x20f   : > { %v2001_v35 = vadd.f32 %v3581_v11, %v1861_v52  ;;  %v3214_v55 = vpop.eup %3213  ;;  %v1531_v40 = vadd.f32 1.0, %v3212_v29 }
 0x210   : > { %v1798_v15 = vmul.f32 %v3575_v3, %v1658_v50  ;;  %v1722_v57 = vmul.f32 %v1594_v38, %v1210_v14  ;;  %v1595_v32 = vadd.f32 1.0, %v3214_v55 }
 0x211   : > { %v2813_v26 = vpack.c.bf16 %v2001_v35, %v2000_v33  ;;  %v1659_v12 = vmul.f32 %v1531_v40, %v1147_v53 }
 0x212   : > { %v1862_v62 = vmul.f32 %v3575_v3, %v1722_v57  ;;  %v1723_v39 = vmul.f32 %v1595_v32, %v1211_v43  ;;  %v1938_v21 = vadd.f32 %v3577_v6, %v1798_v15 }
 0x213   : > { %2450 = vst [vmem:[%s3662_s30 + $0x1f0] sm:$0xff] %v2813_v26  ;;  %v1799_v60 = vmul.f32 %v3579_v10, %v1659_v12 }
 0x214   : > { %v2002_v24 = vadd.f32 %v3577_v6, %v1862_v62  ;;  %v1863_v8 = vmul.f32 %v3579_v10, %v1723_v39  ;;  %2459 = sbr.rel (!%p3436_p10) target bundleno = 570 (0x23a), region = 78 }
 0x215   : > { %v1939_v28 = vadd.f32 %v3581_v11, %v1799_v60 }
 0x216   : > { %v2003_v54 = vadd.f32 %v3581_v11, %v1863_v8 }
 0x217   : > { %v2782_v45 = vpack.c.bf16 %v1939_v28, %v1938_v21 }
 0x218   : > { %v2814_v23 = vpack.c.bf16 %v2003_v54, %v2002_v24 }
 0x219   : > { %2419 = vst [vmem:[%s3662_s30 + $0xf8] sm:$0xff] %v2782_v45 }
 0x21a   : > { %2451 = vst [vmem:[%s3662_s30 + $0x1f8] sm:$0xff] %v2814_v23 }
 0x21b   : > { %s4934_s5 = smov (!%p2463_p5, %s2462_s5), 64 }
 0x21c   : > { %s4722_s9 = sshll.u32 %s4934_s5, 7 }
 0x21d   : > { %s2468_s13 = ssub.s32 8192, %s4722_s9 }
 0x21e   : > { %2469 = vsyncadd %s4717_s6, %s2468_s13  ;;  %p2743_p6 = scmp.ne.s32.totalorder %s4722_s9, 0  ;;  %s2816_s14 = sshll.u32 %s3313_s21, 8 }
 0x21f   : > { %s2472_s10 = sadd.s32 %s2816_s14, %s3565_s26  ;;  %s2476_s25 = sshll.u32 %s3662_s30, 4  ;;  %s4730_s25 = int_to_ptr.vmem [resolvable:$true] %s2476_s25 }
 0x220   : > { %s2745_s18 = sshll.u32 %s2472_s10, 6  ;;  %s3215_s5 = scalar_lea.vmem %s4730_s25, %s4722_s9 }
 0x221   : > { %s4735_s29 = scalar_lea.hbm %s4800_s4, %s2745_s18  ;;  %p3216_p7 = scmp.ne.s32.totalorder %s4730_s25, %s3215_s5 }
 0x222   : > { %s3328_s13 = smov [#allocation3]  }
 0x223   : > { %p3217_p8 = pnand %p3216_p7, %p2743_p6  ;;  %s3219_s21 = sshll.u32 %s3328_s13, 4  ;;  %s3220_s21 = int_to_ptr.vmem [resolvable:$false] %s3219_s21 }
 0x224   : > { %s3221_s26 = scalar_lea.vmem %s3220_s21, 16384  ;;  %p3222_p10 = scmp.lt.s32.totalorder %s4730_s25, %s3220_s21 }
 0x225   : > { %p3218_p9 = pneg %p3217_p8  ;;  %p3223_p11 = scmp.lt.s32.totalorder %s3221_s26, %s3215_s5 }
 0x227   : > { %p3224_p13 = por %p3223_p11, %p3222_p10 }
 0x229   : > { %p3225_p0 = pnand %p3224_p13, %p3218_p9 }
 0x22b   : > { %3228 = shalt.err (!%p3225_p0)
}
 0x22c   : > { %s3229_s30 = scalar_lea.hbm %s4735_s29, %s4722_s9  ;;  %s3233_s18 = scalar_lea.hbm %s4800_s4, 20480 }
 0x22d   : > { %p3230_p1 = scmp.ne.s32.totalorder %s4735_s29, %s3229_s30  ;;  %p3234_p4 = scmp.lt.u32.totalorder %s4735_s29, %s4800_s4 }
 0x22e   : > { %p3235_p5 = scmp.lt.u32.totalorder %s3233_s18, %s3229_s30  ;;  %p3237_p8 = scmp.lt.u32.totalorder %s3229_s30, %s4735_s29 }
 0x22f   : > { %p3231_p2 = pnand %p3230_p1, %p2743_p6 }
 0x230   : > { %p3236_p7 = por %p3235_p5, %p3234_p4 }
 0x231   : > { %p3232_p3 = pneg %p3231_p2 }
 0x232   : > { %p3238_p9 = por %p3237_p8, %p3236_p7 }
 0x234   : > { %p3239_p10 = pnand %p3238_p9, %p3232_p3 }
 0x236   : > { %3242 = shalt.err (!%p3239_p10)
}
 0x237   : > { %s3329_s5 = smov 128   ;;  %s3330_s13 = smov 256  }
 0x238   : > { %s3331_s21 = smov 8  }
 0x239   : > { %2482 = dma.vmem_to_hbm [thread:$0]  (%p2743_p6), %s4730_s25, %s4722_s9, %s4735_s29, %s4717_s6, %s3329_s5, %s3330_s13, %s3331_s21  }
 0x23a PF: > { %p2830_p11 = scmp.ge.s32.totalorder %s3325_s24, 2  ;;  %s2491_s26 = sand.u32 1, %s3289_s15  }
 0x23b   : > { %s2492_s30 = scalar_lea.sflag [#allocation4], %s2491_s26 }
 0x23c   : > { %p2827_p13 = pnand %p2830_p11, %p3443_p12 }
 0x23e   : > { %3284 = dma.done.wait (!%p2827_p13), %s2492_s30, 8192  }
 0x23f   : > { %3286 = vsyncadd (!%p2827_p13), %s2492_s30, 4294959104  ;;  %s17_s24 = sadd.s32 1, %s3325_s24   ;;  %s4918_s15 = smov %s3293_s16 }
 0x240   : > { %p14_p0 = scmp.ge.s32.totalorder %s17_s24, 6   ;;  %s4919_s16 = smov %s3297_s17 }
 0x241   : > { %s4920_s17 = smov %s3441_s11  ;;  %s4921_s18 = smov %s3305_s19 }
 0x242   : > { %s4922_s19 = smov %s3430_s7  ;;  %s4923_s20 = smov %s3317_s22 }
 0x243   : > { %s4924_s21 = smov %s3321_s23  ;;  %s4925_s22 = smov %s4928_s27 }
 0x244   : > { %s4926_s23 = smov %s4932_s28  ;;  %16 = sbr.rel (!%p14_p0) target bundleno = 6 (0x6), region = 123 }
 0x24b   :  { %2497 = vsyncpa [#allocation4], 1 }
 0x24c   :  { %2499 = vsyncpa [#allocation4 + $0x1], 1 }

</bundles_post_ra>
